<compile_context>
chip_gen: v7x
topology: tpu7x:2x2x1
jax: 0.10.0
libtpu: 0.0.40
codegen_flags: <defaults>
</compile_context>

<pallas_src>
import numpy as np
import jax
import jax.numpy as jnp
from jax import lax
from jax.experimental import pallas as pl
from jax.experimental.pallas import tpu as pltpu


_MAX_BLOCK_BATCH = 64   # samples per grid step (review: sweep 32-128, cap for v7x VMEM)
_NEG = -1e30            # pad value for the 128-lane logits


def _cdiv(a, b):
    return -(-a // b)


# ---------------------------------------------------------------------------
# Pallas kernel: whole forward pass for one block of `b` samples.
# ---------------------------------------------------------------------------
def lenet_kernel(x_ref, w1_ref, b1_ref, w2_ref, b2_ref,
                 fc1_ref, fc1b_ref, fc2_ref, fc2b_ref, o_ref):
    """Layouts (rows are spatial-major / batch-minor, so every row regrouping
    below is a tile-aligned view when b % 8 == 0):
      x_ref  : (28, b, 28)   x[r, n, q] = image[n, r, q]
      w1_ref : (140, 256)    rows = ky*28 + q ; lanes = dx*128 + pw*60 + w6*10 + c
      b1_ref : (1, 128)      lanes = pw*60 + w6*10 + c
      w2_ref : (4, 768, 80)  [ey*2+ex, ay*128 + (pw*60+w6*10+c), j2*20 + c2]
      b2_ref : (1, 80)       lanes = j2*20 + c2
      fc1_ref: (320, 64)     rows = i2*80 + j2*20 + c2 (matches in-kernel order)
      fc2_ref: (64, 128)     cols >= 10 zero; fc2b pads them to -1e30
      o_ref  : (b, 128)      lane-dense log-softmax (cols >= 10 are junk)
    """
    b = o_ref.shape[0]
    f32 = jnp.float32

    # ---- conv1 (+ folded 2x2 max-pool) as 4 matmuls ------------------------
    x4 = x_ref[...].reshape(7, 4, b, 28)            # image row r = 4*h7 + s0
    # slab[s][(h6, n), q] = image[n, 4*h6 + s, q]   (pure views of x4)
    slabs = [x4[s // 4:s // 4 + 6, s % 4].reshape(6 * b, 28) for s in range(8)]

    w1 = w1_ref[...]
    pooled = [None, None]                           # row-pool phase ph = 0, 1
    for sy in range(4):                             # conv1 output row y = 4*h6 + sy
        lhs = jnp.concatenate(slabs[sy:sy + 5], axis=1)               # (6b, 140)
        v = jnp.dot(lhs, w1, preferred_element_type=f32)              # (6b, 256)
        ph = sy // 2
        pooled[ph] = v if pooled[ph] is None else jnp.maximum(pooled[ph], v)

    b1 = b1_ref[...]
    # column-pool phase dx sits in two aligned 128-lane halves; bias after max
    # is valid (bias constant over the window), then relu.
    h1 = [jnp.maximum(jnp.maximum(pr[:, 0:128], pr[:, 128:256]) + b1, 0.0)
          .reshape(6, b, 128) for pr in pooled]     # h1[ph][(h6, n), pw*60+w6*10+c]

    # ---- conv2 (+ folded 2x2 max-pool): one shared LHS, 4 matmuls ----------
    lhs2 = jnp.concatenate(
        [h1[ay % 2][ay // 2:ay // 2 + 4].reshape(4 * b, 128) for ay in range(6)],
        axis=1)                                     # (4b, 768), rows = (i2, n)

    z2 = None
    for phase in range(4):                          # 2x2 pool phases (ey, ex)
        zp = jnp.dot(lhs2, w2_ref[phase], preferred_element_type=f32)  # (4b, 80)
        z2 = zp if z2 is None else jnp.maximum(z2, zp)
    h2 = jnp.maximum(z2 + b2_ref[...], 0.0)         # (4b, 80), lanes = j2*20 + c2

    # ---- fc1 -> relu -> fc2 -> log-softmax ---------------------------------
    h2r = h2.reshape(4, b, 80)
    feats = jnp.concatenate([h2r[i] for i in range(4)], axis=1)        # (b, 320)
    a1 = jnp.maximum(
        jnp.dot(feats, fc1_ref[...], preferred_element_type=f32) + fc1b_ref[...],
        0.0)                                        # (b, 64)
    logits = jnp.dot(a1, fc2_ref[...], preferred_element_type=f32) + fc2b_ref[...]
    zc = logits - jnp.max(logits, axis=1, keepdims=True)
    o_ref[...] = zc - jnp.log(jnp.sum(jnp.exp(zc), axis=1, keepdims=True))


# ---------------------------------------------------------------------------
# Wrapper: layout transpose (1x input bytes) + one pallas_call.
# ---------------------------------------------------------------------------
def _block_batch(n):
    if n <= _MAX_BLOCK_BATCH:
        return n, 1                  # single grid step (v5e/v6e: one TensorCore)
    return _MAX_BLOCK_BATCH, _cdiv(n, _MAX_BLOCK_BATCH)


@jax.jit
def model_forward(x_nchw, prep):
    n = x_nchw.shape[0]
    b, nb = _block_batch(n)
    n_pad = b * nb

    img = x_nchw[:, 0]                               # (N, 28, 28), Cin == 1
    if n_pad != n:
        img = jnp.pad(img, ((0, n_pad - n), (0, 0), (0, 0)))
    xt = jnp.transpose(img, (1, 0, 2))               # (28, n_pad, 28): rows=(r, n)

    out = pl.pallas_call(
        lenet_kernel,
        out_shape=jax.ShapeDtypeStruct((n_pad, 128), jnp.float32),
        grid=(nb,),
        in_specs=[
            pl.BlockSpec((28, b, 28), lambda i: (0, i, 0)),
            pl.BlockSpec((140, 256), lambda i: (0, 0)),
            pl.BlockSpec((1, 128), lambda i: (0, 0)),
            pl.BlockSpec((4, 768, 80), lambda i: (0, 0, 0)),
            pl.BlockSpec((1, 80), lambda i: (0, 0)),
            pl.BlockSpec((320, 64), lambda i: (0, 0)),
            pl.BlockSpec((1, 64), lambda i: (0, 0)),
            pl.BlockSpec((64, 128), lambda i: (0, 0)),
            pl.BlockSpec((1, 128), lambda i: (0, 0)),
        ],
        out_specs=pl.BlockSpec((b, 128), lambda i: (i, 0)),
        compiler_params=pltpu.CompilerParams(dimension_semantics=("parallel",)),
    )(xt, prep["w1"], prep["b1"], prep["w2"], prep["b2"],
      prep["fc1"], prep["fc1b"], prep["fc2"], prep["fc2b"])
    return out[:n, :10]


# ---------------------------------------------------------------------------
# One-time parameter re-layout (numpy, hoisted out of the hot path).
# ---------------------------------------------------------------------------
def prepare_params(params):
    w1 = np.asarray(params["conv1_w"], np.float32)[:, 0]     # (10, 5, 5)
    b1 = np.asarray(params["conv1_b"], np.float32)
    w2 = np.asarray(params["conv2_w"], np.float32)            # (20, 10, 5, 5)
    b2 = np.asarray(params["conv2_b"], np.float32)
    fc1w = np.asarray(params["fc1_w"], np.float32)             # (64, 320)
    fc1b = np.asarray(params["fc1_b"], np.float32)
    fc2w = np.asarray(params["fc2_w"], np.float32)             # (10, 64)
    fc2b = np.asarray(params["fc2_b"], np.float32)

    # conv1: K = (ky, q); output lanes = dx*128 + pw*60 + w6*10 + c.
    W1 = np.zeros((140, 256), np.float32)
    for dx in range(2):
        for pw in range(2):
            for w6 in range(6):
                x0 = 4 * w6 + 2 * pw + dx
                col = dx * 128 + pw * 60 + w6 * 10
                for ky in range(5):
                    for kx in range(5):
                        W1[ky * 28 + x0 + kx, col:col + 10] = w1[:, ky, kx]
    B1 = np.zeros((1, 128), np.float32)
    for pw in range(2):
        for w6 in range(6):
            B1[0, pw * 60 + w6 * 10: pw * 60 + w6 * 10 + 10] = b1

    # conv2: one (768, 80) weight per 2x2-pool phase p = ey*2 + ex.
    W2 = np.zeros((4, 768, 80), np.float32)
    for ey in range(2):
        for ex in range(2):
            p = ey * 2 + ex
            for ay in range(6):
                ky = ay - ey
                if not (0 <= ky <= 4):
                    continue
                for j2 in range(4):
                    for w6 in range(6):
                        for pw in range(2):
                            kx = (2 * w6 + pw) - 2 * j2 - ex
                            if not (0 <= kx <= 4):
                                continue
                            r = ay * 128 + pw * 60 + w6 * 10
                            W2[p, r:r + 10, j2 * 20:(j2 + 1) * 20] = w2[:, :, ky, kx].T
    B2 = np.tile(b2, 4)[None, :].astype(np.float32)            # (1, 80)

    # fc1: rows permuted from torch's (c2, i2, j2) flatten order to ours.
    FC1 = np.ascontiguousarray(
        np.transpose(fc1w.reshape(64, 20, 4, 4), (2, 3, 1, 0)).reshape(320, 64))
    FC1B = fc1b.reshape(1, 64)

    # fc2: padded to 128 output lanes; pad-lane bias -1e30 makes the in-kernel
    # 128-lane log-softmax exactly match the 10-class one on the real lanes.
    FC2 = np.zeros((64, 128), np.float32)
    FC2[:, :10] = fc2w.T
    FC2B = np.full((1, 128), _NEG, np.float32)
    FC2B[0, :10] = fc2b

    host = dict(w1=W1, b1=B1, w2=W2, b2=B2, fc1=FC1, fc1b=FC1B, fc2=FC2, fc2b=FC2B)
    return {k: jnp.asarray(v) for k, v in host.items()}


def init_params(key):
    # Deterministic, PyTorch-shaped parameters (uniform +/- 1/sqrt(fan_in)).
    def uni(k, shape, fan_in):
        bound = 1.0 / (fan_in ** 0.5)
        return jax.random.uniform(k, shape, jnp.float32, -bound, bound)
    ks = jax.random.split(key, 8)
    return {
        "conv1_w": uni(ks[0], (10, 1, 5, 5), 25),
        "conv1_b": uni(ks[1], (10,), 25),
        "conv2_w": uni(ks[2], (20, 10, 5, 5), 250),
        "conv2_b": uni(ks[3], (20,), 250),
        "fc1_w": uni(ks[4], (64, 320), 320),
        "fc1_b": uni(ks[5], (64,), 320),
        "fc2_w": uni(ks[6], (10, 64), 64),
        "fc2_b": uni(ks[7], (10,), 64),
    }


# Pure-JAX reference of the PyTorch module (in-script correctness check).
@jax.jit
def reference_forward(x, params):
    dn = ("NCHW", "OIHW", "NCHW")
    h = lax.conv_general_dilated(x, params["conv1_w"], (1, 1), "VALID",
                                 dimension_numbers=dn)
    h = h + params["conv1_b"].reshape(1, -1, 1, 1)
    h = jax.nn.relu(lax.reduce_window(h, -jnp.inf, lax.max,
                                      (1, 1, 2, 2), (1, 1, 2, 2), "VALID"))
    h = lax.conv_general_dilated(h, params["conv2_w"], (1, 1), "VALID",
                                 dimension_numbers=dn)
    h = h + params["conv2_b"].reshape(1, -1, 1, 1)
    h = jax.nn.relu(lax.reduce_window(h, -jnp.inf, lax.max,
                                      (1, 1, 2, 2), (1, 1, 2, 2), "VALID"))
    f = h.reshape(h.shape[0], -1)
    f = jax.nn.relu(f @ params["fc1_w"].T + params["fc1_b"])
    logits = f @ params["fc2_w"].T + params["fc2_b"]
    return jax.nn.log_softmax(logits, axis=1)


if __name__ == "__main__":
    key = jax.random.PRNGKey(0)
    k_x, k_p = jax.random.split(key)
    # MNIST-style input implied by the module: 1 channel, 28x28 (flatten -> 320).
    x = jax.random.normal(k_x, (2, 1, 28, 28), jnp.float32)    # NCHW like torch
    params = init_params(k_p)
    prep = prepare_params(params)                              # one-time prep

    out = jax.block_until_ready(model_forward(x, prep))
    assert out.shape == (2, 10)
    assert bool(jnp.all(jnp.isfinite(out)))

    ref = jax.block_until_ready(reference_forward(x, params))
    assert float(jnp.max(jnp.abs(out - ref))) < 2e-2
    print("KERNEL_OK")
</pallas_src>

<mosaic_0001>
module attributes {stable_mosaic.version = 11 : i64} {
  func.func @lenet_kernel(%arg0: i32, %arg1: memref<28x2x28xf32, #tpu.memory_space<vmem>>, %arg2: memref<140x256xf32, #tpu.memory_space<vmem>>, %arg3: memref<1x128xf32, #tpu.memory_space<vmem>>, %arg4: memref<4x768x80xf32, #tpu.memory_space<vmem>>, %arg5: memref<1x80xf32, #tpu.memory_space<vmem>>, %arg6: memref<320x64xf32, #tpu.memory_space<vmem>>, %arg7: memref<1x64xf32, #tpu.memory_space<vmem>>, %arg8: memref<64x128xf32, #tpu.memory_space<vmem>>, %arg9: memref<1x128xf32, #tpu.memory_space<vmem>>, %arg10: memref<2x128xf32, #tpu.memory_space<vmem>>) attributes {dimension_semantics = [#tpu.dimension_semantics<parallel>], iteration_bounds = array<i64: 1>, scalar_prefetch = 0 : i64, scratch_operands = 0 : i64, tpu.core_type = #tpu.core_type<tc>, window_params = [{transform_indices = @transform_0, window_bounds = array<i64: 28, 2, 28>}, {pipeline_mode = #tpu.pipeline_mode<synchronous>, transform_indices = @transform_1, window_bounds = array<i64: 140, 256>}, {pipeline_mode = #tpu.pipeline_mode<synchronous>, transform_indices = @transform_2, window_bounds = array<i64: 1, 128>}, {pipeline_mode = #tpu.pipeline_mode<synchronous>, transform_indices = @transform_3, window_bounds = array<i64: 4, 768, 80>}, {pipeline_mode = #tpu.pipeline_mode<synchronous>, transform_indices = @transform_4, window_bounds = array<i64: 1, 80>}, {pipeline_mode = #tpu.pipeline_mode<synchronous>, transform_indices = @transform_5, window_bounds = array<i64: 320, 64>}, {pipeline_mode = #tpu.pipeline_mode<synchronous>, transform_indices = @transform_6, window_bounds = array<i64: 1, 64>}, {pipeline_mode = #tpu.pipeline_mode<synchronous>, transform_indices = @transform_7, window_bounds = array<i64: 64, 128>}, {pipeline_mode = #tpu.pipeline_mode<synchronous>, transform_indices = @transform_8, window_bounds = array<i64: 1, 128>}, {transform_indices = @transform_9, window_bounds = array<i64: 2, 128>}]} {
    %c0 = arith.constant 0 : index
    %c0_0 = arith.constant 0 : index
    %c0_1 = arith.constant 0 : index
    %0 = vector.load %arg1[%c0, %c0_0, %c0_1] : memref<28x2x28xf32, #tpu.memory_space<vmem>>, vector<28x2x28xf32>
    %1 = vector.shape_cast %0 : vector<28x2x28xf32> to vector<7x4x2x28xf32>
    %2 = vector.extract_strided_slice %1 {offsets = [0, 0, 0, 0], sizes = [6, 1, 2, 28], strides = [1, 1, 1, 1]} : vector<7x4x2x28xf32> to vector<6x1x2x28xf32>
    %3 = vector.shape_cast %2 : vector<6x1x2x28xf32> to vector<6x2x28xf32>
    %4 = vector.shape_cast %3 : vector<6x2x28xf32> to vector<12x28xf32>
    %5 = vector.extract_strided_slice %1 {offsets = [0, 1, 0, 0], sizes = [6, 1, 2, 28], strides = [1, 1, 1, 1]} : vector<7x4x2x28xf32> to vector<6x1x2x28xf32>
    %6 = vector.shape_cast %5 : vector<6x1x2x28xf32> to vector<6x2x28xf32>
    %7 = vector.shape_cast %6 : vector<6x2x28xf32> to vector<12x28xf32>
    %8 = vector.extract_strided_slice %1 {offsets = [0, 2, 0, 0], sizes = [6, 1, 2, 28], strides = [1, 1, 1, 1]} : vector<7x4x2x28xf32> to vector<6x1x2x28xf32>
    %9 = vector.shape_cast %8 : vector<6x1x2x28xf32> to vector<6x2x28xf32>
    %10 = vector.shape_cast %9 : vector<6x2x28xf32> to vector<12x28xf32>
    %11 = vector.extract_strided_slice %1 {offsets = [0, 3, 0, 0], sizes = [6, 1, 2, 28], strides = [1, 1, 1, 1]} : vector<7x4x2x28xf32> to vector<6x1x2x28xf32>
    %12 = vector.shape_cast %11 : vector<6x1x2x28xf32> to vector<6x2x28xf32>
    %13 = vector.shape_cast %12 : vector<6x2x28xf32> to vector<12x28xf32>
    %14 = vector.extract_strided_slice %1 {offsets = [1, 0, 0, 0], sizes = [6, 1, 2, 28], strides = [1, 1, 1, 1]} : vector<7x4x2x28xf32> to vector<6x1x2x28xf32>
    %15 = vector.shape_cast %14 : vector<6x1x2x28xf32> to vector<6x2x28xf32>
    %16 = vector.shape_cast %15 : vector<6x2x28xf32> to vector<12x28xf32>
    %17 = vector.extract_strided_slice %1 {offsets = [1, 1, 0, 0], sizes = [6, 1, 2, 28], strides = [1, 1, 1, 1]} : vector<7x4x2x28xf32> to vector<6x1x2x28xf32>
    %18 = vector.shape_cast %17 : vector<6x1x2x28xf32> to vector<6x2x28xf32>
    %19 = vector.shape_cast %18 : vector<6x2x28xf32> to vector<12x28xf32>
    %20 = vector.extract_strided_slice %1 {offsets = [1, 2, 0, 0], sizes = [6, 1, 2, 28], strides = [1, 1, 1, 1]} : vector<7x4x2x28xf32> to vector<6x1x2x28xf32>
    %21 = vector.shape_cast %20 : vector<6x1x2x28xf32> to vector<6x2x28xf32>
    %22 = vector.shape_cast %21 : vector<6x2x28xf32> to vector<12x28xf32>
    %23 = vector.extract_strided_slice %1 {offsets = [1, 3, 0, 0], sizes = [6, 1, 2, 28], strides = [1, 1, 1, 1]} : vector<7x4x2x28xf32> to vector<6x1x2x28xf32>
    %24 = vector.shape_cast %23 : vector<6x1x2x28xf32> to vector<6x2x28xf32>
    %25 = vector.shape_cast %24 : vector<6x2x28xf32> to vector<12x28xf32>
    %c0_2 = arith.constant 0 : index
    %c0_3 = arith.constant 0 : index
    %26 = vector.load %arg2[%c0_2, %c0_3] : memref<140x256xf32, #tpu.memory_space<vmem>>, vector<140x256xf32>
    %27 = tpu.concatenate %4, %7, %10, %13, %16 in 1 : vector<12x28xf32>, vector<12x28xf32>, vector<12x28xf32>, vector<12x28xf32>, vector<12x28xf32> -> vector<12x140xf32>
    %cst = arith.constant dense<0.000000e+00> : vector<12x256xf32>
    %28 = tpu.matmul %27, %26, %cst {dimension_numbers = #tpu.dot_dimension_numbers<[1], [0], [0], [1], [0, 0, 1, 1], [], []>} : vector<12x140xf32>, vector<140x256xf32>, vector<12x256xf32> -> vector<12x256xf32>
    %29 = tpu.concatenate %7, %10, %13, %16, %19 in 1 : vector<12x28xf32>, vector<12x28xf32>, vector<12x28xf32>, vector<12x28xf32>, vector<12x28xf32> -> vector<12x140xf32>
    %cst_4 = arith.constant dense<0.000000e+00> : vector<12x256xf32>
    %30 = tpu.matmul %29, %26, %cst_4 {dimension_numbers = #tpu.dot_dimension_numbers<[1], [0], [0], [1], [0, 0, 1, 1], [], []>} : vector<12x140xf32>, vector<140x256xf32>, vector<12x256xf32> -> vector<12x256xf32>
    %31 = arith.maximumf %28, %30 : vector<12x256xf32>
    %32 = tpu.concatenate %10, %13, %16, %19, %22 in 1 : vector<12x28xf32>, vector<12x28xf32>, vector<12x28xf32>, vector<12x28xf32>, vector<12x28xf32> -> vector<12x140xf32>
    %cst_5 = arith.constant dense<0.000000e+00> : vector<12x256xf32>
    %33 = tpu.matmul %32, %26, %cst_5 {dimension_numbers = #tpu.dot_dimension_numbers<[1], [0], [0], [1], [0, 0, 1, 1], [], []>} : vector<12x140xf32>, vector<140x256xf32>, vector<12x256xf32> -> vector<12x256xf32>
    %34 = tpu.concatenate %13, %16, %19, %22, %25 in 1 : vector<12x28xf32>, vector<12x28xf32>, vector<12x28xf32>, vector<12x28xf32>, vector<12x28xf32> -> vector<12x140xf32>
    %cst_6 = arith.constant dense<0.000000e+00> : vector<12x256xf32>
    %35 = tpu.matmul %34, %26, %cst_6 {dimension_numbers = #tpu.dot_dimension_numbers<[1], [0], [0], [1], [0, 0, 1, 1], [], []>} : vector<12x140xf32>, vector<140x256xf32>, vector<12x256xf32> -> vector<12x256xf32>
    %36 = arith.maximumf %33, %35 : vector<12x256xf32>
    %c0_7 = arith.constant 0 : index
    %c0_8 = arith.constant 0 : index
    %37 = vector.load %arg3[%c0_7, %c0_8] : memref<1x128xf32, #tpu.memory_space<vmem>>, vector<1x128xf32>
    %38 = vector.extract_strided_slice %31 {offsets = [0, 0], sizes = [12, 128], strides = [1, 1]} : vector<12x256xf32> to vector<12x128xf32>
    %39 = vector.extract_strided_slice %31 {offsets = [0, 128], sizes = [12, 128], strides = [1, 1]} : vector<12x256xf32> to vector<12x128xf32>
    %40 = arith.maximumf %38, %39 : vector<12x128xf32>
    %41 = vector.broadcast %37 : vector<1x128xf32> to vector<12x128xf32>
    %42 = arith.addf %40, %41 : vector<12x128xf32>
    %cst_9 = arith.constant 0.000000e+00 : f32
    %43 = vector.broadcast %cst_9 : f32 to vector<12x128xf32>
    %44 = arith.maximumf %42, %43 : vector<12x128xf32>
    %45 = vector.shape_cast %44 : vector<12x128xf32> to vector<6x2x128xf32>
    %46 = vector.extract_strided_slice %36 {offsets = [0, 0], sizes = [12, 128], strides = [1, 1]} : vector<12x256xf32> to vector<12x128xf32>
    %47 = vector.extract_strided_slice %36 {offsets = [0, 128], sizes = [12, 128], strides = [1, 1]} : vector<12x256xf32> to vector<12x128xf32>
    %48 = arith.maximumf %46, %47 : vector<12x128xf32>
    %49 = vector.broadcast %37 : vector<1x128xf32> to vector<12x128xf32>
    %50 = arith.addf %48, %49 : vector<12x128xf32>
    %cst_10 = arith.constant 0.000000e+00 : f32
    %51 = vector.broadcast %cst_10 : f32 to vector<12x128xf32>
    %52 = arith.maximumf %50, %51 : vector<12x128xf32>
    %53 = vector.shape_cast %52 : vector<12x128xf32> to vector<6x2x128xf32>
    %54 = vector.extract_strided_slice %45 {offsets = [0, 0, 0], sizes = [4, 2, 128], strides = [1, 1, 1]} : vector<6x2x128xf32> to vector<4x2x128xf32>
    %55 = vector.shape_cast %54 : vector<4x2x128xf32> to vector<8x128xf32>
    %56 = vector.extract_strided_slice %53 {offsets = [0, 0, 0], sizes = [4, 2, 128], strides = [1, 1, 1]} : vector<6x2x128xf32> to vector<4x2x128xf32>
    %57 = vector.shape_cast %56 : vector<4x2x128xf32> to vector<8x128xf32>
    %58 = vector.extract_strided_slice %45 {offsets = [1, 0, 0], sizes = [4, 2, 128], strides = [1, 1, 1]} : vector<6x2x128xf32> to vector<4x2x128xf32>
    %59 = vector.shape_cast %58 : vector<4x2x128xf32> to vector<8x128xf32>
    %60 = vector.extract_strided_slice %53 {offsets = [1, 0, 0], sizes = [4, 2, 128], strides = [1, 1, 1]} : vector<6x2x128xf32> to vector<4x2x128xf32>
    %61 = vector.shape_cast %60 : vector<4x2x128xf32> to vector<8x128xf32>
    %62 = vector.extract_strided_slice %45 {offsets = [2, 0, 0], sizes = [4, 2, 128], strides = [1, 1, 1]} : vector<6x2x128xf32> to vector<4x2x128xf32>
    %63 = vector.shape_cast %62 : vector<4x2x128xf32> to vector<8x128xf32>
    %64 = vector.extract_strided_slice %53 {offsets = [2, 0, 0], sizes = [4, 2, 128], strides = [1, 1, 1]} : vector<6x2x128xf32> to vector<4x2x128xf32>
    %65 = vector.shape_cast %64 : vector<4x2x128xf32> to vector<8x128xf32>
    %66 = tpu.concatenate %55, %57, %59, %61, %63, %65 in 1 : vector<8x128xf32>, vector<8x128xf32>, vector<8x128xf32>, vector<8x128xf32>, vector<8x128xf32>, vector<8x128xf32> -> vector<8x768xf32>
    %c0_11 = arith.constant 0 : index
    %c0_12 = arith.constant 0 : index
    %c0_13 = arith.constant 0 : index
    %67 = vector.load %arg4[%c0_11, %c0_12, %c0_13] : memref<4x768x80xf32, #tpu.memory_space<vmem>>, vector<1x768x80xf32>
    %68 = vector.shape_cast %67 : vector<1x768x80xf32> to vector<768x80xf32>
    %cst_14 = arith.constant dense<0.000000e+00> : vector<8x80xf32>
    %69 = tpu.matmul %66, %68, %cst_14 {dimension_numbers = #tpu.dot_dimension_numbers<[1], [0], [0], [1], [0, 0, 1, 1], [], []>} : vector<8x768xf32>, vector<768x80xf32>, vector<8x80xf32> -> vector<8x80xf32>
    %c1 = arith.constant 1 : index
    %c0_15 = arith.constant 0 : index
    %c0_16 = arith.constant 0 : index
    %70 = vector.load %arg4[%c1, %c0_15, %c0_16] : memref<4x768x80xf32, #tpu.memory_space<vmem>>, vector<1x768x80xf32>
    %71 = vector.shape_cast %70 : vector<1x768x80xf32> to vector<768x80xf32>
    %cst_17 = arith.constant dense<0.000000e+00> : vector<8x80xf32>
    %72 = tpu.matmul %66, %71, %cst_17 {dimension_numbers = #tpu.dot_dimension_numbers<[1], [0], [0], [1], [0, 0, 1, 1], [], []>} : vector<8x768xf32>, vector<768x80xf32>, vector<8x80xf32> -> vector<8x80xf32>
    %73 = arith.maximumf %69, %72 : vector<8x80xf32>
    %c2 = arith.constant 2 : index
    %c0_18 = arith.constant 0 : index
    %c0_19 = arith.constant 0 : index
    %74 = vector.load %arg4[%c2, %c0_18, %c0_19] : memref<4x768x80xf32, #tpu.memory_space<vmem>>, vector<1x768x80xf32>
    %75 = vector.shape_cast %74 : vector<1x768x80xf32> to vector<768x80xf32>
    %cst_20 = arith.constant dense<0.000000e+00> : vector<8x80xf32>
    %76 = tpu.matmul %66, %75, %cst_20 {dimension_numbers = #tpu.dot_dimension_numbers<[1], [0], [0], [1], [0, 0, 1, 1], [], []>} : vector<8x768xf32>, vector<768x80xf32>, vector<8x80xf32> -> vector<8x80xf32>
    %77 = arith.maximumf %73, %76 : vector<8x80xf32>
    %c3 = arith.constant 3 : index
    %c0_21 = arith.constant 0 : index
    %c0_22 = arith.constant 0 : index
    %78 = vector.load %arg4[%c3, %c0_21, %c0_22] : memref<4x768x80xf32, #tpu.memory_space<vmem>>, vector<1x768x80xf32>
    %79 = vector.shape_cast %78 : vector<1x768x80xf32> to vector<768x80xf32>
    %cst_23 = arith.constant dense<0.000000e+00> : vector<8x80xf32>
    %80 = tpu.matmul %66, %79, %cst_23 {dimension_numbers = #tpu.dot_dimension_numbers<[1], [0], [0], [1], [0, 0, 1, 1], [], []>} : vector<8x768xf32>, vector<768x80xf32>, vector<8x80xf32> -> vector<8x80xf32>
    %81 = arith.maximumf %77, %80 : vector<8x80xf32>
    %c0_24 = arith.constant 0 : index
    %c0_25 = arith.constant 0 : index
    %82 = vector.load %arg5[%c0_24, %c0_25] : memref<1x80xf32, #tpu.memory_space<vmem>>, vector<1x80xf32>
    %83 = vector.broadcast %82 : vector<1x80xf32> to vector<8x80xf32>
    %84 = arith.addf %81, %83 : vector<8x80xf32>
    %cst_26 = arith.constant 0.000000e+00 : f32
    %85 = vector.broadcast %cst_26 : f32 to vector<8x80xf32>
    %86 = arith.maximumf %84, %85 : vector<8x80xf32>
    %87 = vector.shape_cast %86 : vector<8x80xf32> to vector<4x2x80xf32>
    %88 = vector.extract_strided_slice %87 {offsets = [0, 0, 0], sizes = [1, 2, 80], strides = [1, 1, 1]} : vector<4x2x80xf32> to vector<1x2x80xf32>
    %89 = vector.shape_cast %88 : vector<1x2x80xf32> to vector<2x80xf32>
    %90 = vector.extract_strided_slice %87 {offsets = [1, 0, 0], sizes = [1, 2, 80], strides = [1, 1, 1]} : vector<4x2x80xf32> to vector<1x2x80xf32>
    %91 = vector.shape_cast %90 : vector<1x2x80xf32> to vector<2x80xf32>
    %92 = vector.extract_strided_slice %87 {offsets = [2, 0, 0], sizes = [1, 2, 80], strides = [1, 1, 1]} : vector<4x2x80xf32> to vector<1x2x80xf32>
    %93 = vector.shape_cast %92 : vector<1x2x80xf32> to vector<2x80xf32>
    %94 = vector.extract_strided_slice %87 {offsets = [3, 0, 0], sizes = [1, 2, 80], strides = [1, 1, 1]} : vector<4x2x80xf32> to vector<1x2x80xf32>
    %95 = vector.shape_cast %94 : vector<1x2x80xf32> to vector<2x80xf32>
    %96 = tpu.concatenate %89, %91, %93, %95 in 1 : vector<2x80xf32>, vector<2x80xf32>, vector<2x80xf32>, vector<2x80xf32> -> vector<2x320xf32>
    %c0_27 = arith.constant 0 : index
    %c0_28 = arith.constant 0 : index
    %97 = vector.load %arg6[%c0_27, %c0_28] : memref<320x64xf32, #tpu.memory_space<vmem>>, vector<320x64xf32>
    %cst_29 = arith.constant dense<0.000000e+00> : vector<2x64xf32>
    %98 = tpu.matmul %96, %97, %cst_29 {dimension_numbers = #tpu.dot_dimension_numbers<[1], [0], [0], [1], [0, 0, 1, 1], [], []>} : vector<2x320xf32>, vector<320x64xf32>, vector<2x64xf32> -> vector<2x64xf32>
    %c0_30 = arith.constant 0 : index
    %c0_31 = arith.constant 0 : index
    %99 = vector.load %arg7[%c0_30, %c0_31] : memref<1x64xf32, #tpu.memory_space<vmem>>, vector<1x64xf32>
    %100 = vector.broadcast %99 : vector<1x64xf32> to vector<2x64xf32>
    %101 = arith.addf %98, %100 : vector<2x64xf32>
    %cst_32 = arith.constant 0.000000e+00 : f32
    %102 = vector.broadcast %cst_32 : f32 to vector<2x64xf32>
    %103 = arith.maximumf %101, %102 : vector<2x64xf32>
    %c0_33 = arith.constant 0 : index
    %c0_34 = arith.constant 0 : index
    %104 = vector.load %arg8[%c0_33, %c0_34] : memref<64x128xf32, #tpu.memory_space<vmem>>, vector<64x128xf32>
    %cst_35 = arith.constant dense<0.000000e+00> : vector<2x128xf32>
    %105 = tpu.matmul %103, %104, %cst_35 {dimension_numbers = #tpu.dot_dimension_numbers<[1], [0], [0], [1], [0, 0, 1, 1], [], []>} : vector<2x64xf32>, vector<64x128xf32>, vector<2x128xf32> -> vector<2x128xf32>
    %c0_36 = arith.constant 0 : index
    %c0_37 = arith.constant 0 : index
    %106 = vector.load %arg9[%c0_36, %c0_37] : memref<1x128xf32, #tpu.memory_space<vmem>>, vector<1x128xf32>
    %107 = vector.broadcast %106 : vector<1x128xf32> to vector<2x128xf32>
    %108 = arith.addf %105, %107 : vector<2x128xf32>
    %cst_38 = arith.constant dense<0xFF800000> : vector<2xf32>
    %109 = vector.multi_reduction <maximumf>, %108, %cst_38 [1] : vector<2x128xf32> to vector<2xf32>
    %110 = vector.shape_cast %109 : vector<2xf32> to vector<2x1xf32>
    %111 = vector.broadcast %110 : vector<2x1xf32> to vector<2x128xf32>
    %112 = arith.subf %108, %111 : vector<2x128xf32>
    %113 = math.exp %112 : vector<2x128xf32>
    %cst_39 = arith.constant dense<0.000000e+00> : vector<2xf32>
    %114 = vector.multi_reduction <add>, %113, %cst_39 [1] : vector<2x128xf32> to vector<2xf32>
    %115 = vector.shape_cast %114 : vector<2xf32> to vector<2x1xf32>
    %116 = math.log %115 : vector<2x1xf32>
    %117 = vector.broadcast %116 : vector<2x1xf32> to vector<2x128xf32>
    %118 = arith.subf %112, %117 : vector<2x128xf32>
    %c0_40 = arith.constant 0 : index
    %c0_41 = arith.constant 0 : index
    %119 = vector.load %arg10[%c0_40, %c0_41] : memref<2x128xf32, #tpu.memory_space<vmem>>, vector<2x128xf32>
    tpu.vector_store %arg10[%c0_40, %c0_41], %118 {strides = array<i32>} : memref<2x128xf32, #tpu.memory_space<vmem>>, vector<2x128xf32>,
    return
  }
  func.func @transform_0(%arg0: i32) -> (i32, i32, i32) {
    %c0_i32 = arith.constant 0 : i32
    %c0_i32_0 = arith.constant 0 : i32
    %c0_i32_1 = arith.constant 0 : i32
    return %c0_i32, %arg0, %c0_i32_0 : i32, i32, i32
  }
  func.func @transform_1(%arg0: i32) -> (i32, i32) {
    %c0_i32 = arith.constant 0 : i32
    %c0_i32_0 = arith.constant 0 : i32
    %c0_i32_1 = arith.constant 0 : i32
    return %c0_i32, %c0_i32_0 : i32, i32
  }
  func.func @transform_2(%arg0: i32) -> (i32, i32) {
    %c0_i32 = arith.constant 0 : i32
    %c0_i32_0 = arith.constant 0 : i32
    %c0_i32_1 = arith.constant 0 : i32
    return %c0_i32, %c0_i32_0 : i32, i32
  }
  func.func @transform_3(%arg0: i32) -> (i32, i32, i32) {
    %c0_i32 = arith.constant 0 : i32
    %c0_i32_0 = arith.constant 0 : i32
    %c0_i32_1 = arith.constant 0 : i32
    %c0_i32_2 = arith.constant 0 : i32
    return %c0_i32, %c0_i32_0, %c0_i32_1 : i32, i32, i32
  }
  func.func @transform_4(%arg0: i32) -> (i32, i32) {
    %c0_i32 = arith.constant 0 : i32
    %c0_i32_0 = arith.constant 0 : i32
    %c0_i32_1 = arith.constant 0 : i32
    return %c0_i32, %c0_i32_0 : i32, i32
  }
  func.func @transform_5(%arg0: i32) -> (i32, i32) {
    %c0_i32 = arith.constant 0 : i32
    %c0_i32_0 = arith.constant 0 : i32
    %c0_i32_1 = arith.constant 0 : i32
    return %c0_i32, %c0_i32_0 : i32, i32
  }
  func.func @transform_6(%arg0: i32) -> (i32, i32) {
    %c0_i32 = arith.constant 0 : i32
    %c0_i32_0 = arith.constant 0 : i32
    %c0_i32_1 = arith.constant 0 : i32
    return %c0_i32, %c0_i32_0 : i32, i32
  }
  func.func @transform_7(%arg0: i32) -> (i32, i32) {
    %c0_i32 = arith.constant 0 : i32
    %c0_i32_0 = arith.constant 0 : i32
    %c0_i32_1 = arith.constant 0 : i32
    return %c0_i32, %c0_i32_0 : i32, i32
  }
  func.func @transform_8(%arg0: i32) -> (i32, i32) {
    %c0_i32 = arith.constant 0 : i32
    %c0_i32_0 = arith.constant 0 : i32
    %c0_i32_1 = arith.constant 0 : i32
    return %c0_i32, %c0_i32_0 : i32, i32
  }
  func.func @transform_9(%arg0: i32) -> (i32, i32) {
    %c0_i32 = arith.constant 0 : i32
    %c0_i32_0 = arith.constant 0 : i32
    return %arg0, %c0_i32 : i32, i32
  }
}

</mosaic_0001>

<bundles_post_ra>
// kernel: model_forward.1
= control target key start
LH: loop header
LB: loop body
LE: loop exit
PB: predicated region body
PF: predicated region fallthrough
CT: control target
= control target key end

     0   :  { %v108_v3 = vlaneseq  ;;  %v4107_v10 = vmov 1983009808   ;;  %s4108_s15 = smov 84   ;;  %s4109_s22 = smov 28   ;;  %s6104_s0 = inlined_call_operand.vmem [shape: f32[28,2,28], index: 0, kind: input, shape index: {}]   ;;  %s6105_s1 = inlined_call_operand.vmem [shape: f32[140,256], index: 1, kind: input, shape index: {}]   ;;  %s6106_s2 = inlined_call_operand.vmem [shape: f32[1,128], index: 2, kind: input, shape index: {}]   ;;  %s6107_s3 = inlined_call_operand.vmem [shape: f32[4,768,80], index: 3, kind: input, shape index: {}]   ;;  %s6108_s4 = inlined_call_operand.vmem [shape: f32[1,80], index: 4, kind: input, shape index: {}]   ;;  %s6109_s5 = inlined_call_operand.vmem [shape: f32[320,64], index: 5, kind: input, shape index: {}]   ;;  %s6110_s6 = inlined_call_operand.vmem [shape: f32[1,64], index: 6, kind: input, shape index: {}]   ;;  %s6111_s7 = inlined_call_operand.vmem [shape: f32[64,128], index: 7, kind: input, shape index: {}]   ;;  %s6112_s8 = inlined_call_operand.vmem [shape: f32[1,128], index: 8, kind: input, shape index: {}]   ;;  %s6113_s9 = inlined_call_operand.hbm [shape: f32[2,128], index: 9, kind: output, shape index: {}]  }
   0x1   :  { %v36_v0 = vld [vmem:[%s6104_s0 + $0x6] sm:$0x3]  ;;  %v4175_v1 = vld [vmem:[%s6104_s0 + $0x8] sm:$0x3]  ;;  %v4180_v2 = vld [vmem:[%s6104_s0 + $0xe] sm:$0x3]  ;;  %v106_v11 = vunpack.c.l.s4 %v4107_v10 }
   0x2   :  { %v4185_v4 = vld [vmem:[%s6104_s0 + $0x10] sm:$0x3]  ;;  %v4190_v5 = vld [vmem:[%s6104_s0 + $0x16] sm:$0x3]  ;;  %v4195_v6 = vld [vmem:[%s6104_s0 + $0x18] sm:$0x3]  ;;  %v210_v15 = vcombine.low %v36_v0, %v4180_v2 }
   0x3   :  { %v4200_v7 = vld [vmem:[%s6104_s0 + $0x1e] sm:$0x3]  ;;  %v4205_v8 = vld [vmem:[%s6104_s0 + $0x20] sm:$0x3]  ;;  %v104_v9 = vcombine.low %v4185_v4, %v4195_v6  ;;  %v109_v12 = vshrl.u32 %v108_v3, 7  ;;  %v107_v19 = vunpack.c.0.s8 %v106_v11  ;;  %v242_v21 = vcombine.low %v4175_v1, %v4185_v4  ;;  %v62_v61 = vld [vmem:[%s6105_s1 + $0x8] sm:$0xff] }
   0x4   :  { %v34_v13 = vld [vmem:[%s6104_s0 + $0x2] sm:$0x3]  ;;  %v35_v14 = vld [vmem:[%s6104_s0 + $0x4] sm:$0x3]  ;;  %v38_v16 = vld [vmem:[%s6104_s0 + $0xa] sm:$0x3]  ;;  %v211_v20 = vcombine.low %v4190_v5, %v4200_v7  ;;  %v243_v22 = vcombine.low %v4195_v6, %v4205_v8 }
   0x5   :  { %v4222_v17 = vld [vmem:[%s6104_s0 + $0xc] sm:$0x3]  ;;  %v42_v18 = vld [vmem:[%s6104_s0 + $0x12] sm:$0x3]  ;;  %v4236_v23 = vld [vmem:[%s6104_s0 + $0x14] sm:$0x3]  ;;  %v136_v26 = vcombine.low %v34_v13, %v38_v16  ;;  %v4257_v32 = vsub.s32 %v107_v19, %v109_v12 }
   0x6   :  { %v46_v24 = vld [vmem:[%s6104_s0 + $0x1a] sm:$0x3]  ;;  %v4244_v25 = vld [vmem:[%s6104_s0 + $0x1c] sm:$0x3]  ;;  %v173_v28 = vcombine.low %v35_v14, %v4222_v17  ;;  %v50_v30 = vld [vmem:[%s6104_s0 + $0x22] sm:$0x3]  ;;  %v395_v51 = vcombine.low %v38_v16, %v42_v18 }
   0x7   :  { %v137_v27 = vcombine.low %v42_v18, %v46_v24  ;;  %v174_v29 = vcombine.low %v4236_v23, %v4244_v25  ;;  %v4255_v31 = vld [vmem:[%s6104_s0 + $0x24] sm:$0x3]  ;;  %v4262_v33 = vld [vmem:[%s6104_s0 + $0x2a] sm:$0x3]  ;;  %v4267_v34 = vld [vmem:[%s6104_s0 + $0x2c] sm:$0x3]  ;;  %v218_v37 = vrot.slane %v210_v15, %v4257_v32  ;;  %v225_v38 = vrot.slane %v211_v20, %v4257_v32 }
   0x8   :  { %v153_v35 = vcombine.low %v50_v30, %v4262_v33  ;;  %v190_v36 = vcombine.low %v4255_v31, %v4267_v34  ;;  %v250_v39 = vrot.slane %v242_v21, %v4257_v32  ;;  %v257_v40 = vrot.slane %v243_v22, %v4257_v32  ;;  %v4287_v47 = vld [vmem:[%s6104_s0 + $0x26] sm:$0x3]  ;;  %v4292_v48 = vld [vmem:[%s6104_s0 + $0x2e] sm:$0x3]  ;;  %v4301_v53 = vld [vmem:[%s6104_s0 + $0x28] sm:$0x3] }
   0x9   :  { %v144_v41 = vrot.slane %v136_v26, %v4257_v32  ;;  %v151_v42 = vrot.slane %v137_v27, %v4257_v32  ;;  %v181_v43 = vrot.slane %v173_v28, %v4257_v32  ;;  %v188_v44 = vrot.slane %v174_v29, %v4257_v32  ;;  %v57_v54 = vld [vmem:[%s6104_s0 + $0x30] sm:$0x3]  ;;  %v64_v62 = vld [vmem:[%s6105_s1 + $0x18] sm:$0xff]  ;;  %v61_v63 = vld [vmem:[%s6105_s1] sm:$0xff]  ;;  %s4110_s29 = smov 112   ;;  %s4111_s13 = smov 56  }
   0xa   :  { %v4280_v45 = vcombine.low %v218_v37, %v225_v38  ;;  %v4282_v46 = vcombine.low %v250_v39, %v257_v40  ;;  %v396_v52 = vcombine.low %v46_v24, %v50_v30  ;;  %v4313_v57 = vrot.slane %v153_v35, %v4257_v32  ;;  %v63_v11 = vld [vmem:[%s6105_s1 + $0x10] sm:$0xff]  ;;  %v66_v12 = vld [vmem:[%s6105_s1 + $0x28] sm:$0xff]  ;;  %v68_v13 = vld [vmem:[%s6105_s1 + $0x38] sm:$0xff] }
   0xb   :  { %v4294_v49 = vcombine.low %v144_v41, %v151_v42  ;;  %v4296_v50 = vcombine.low %v181_v43, %v188_v44  ;;  %v4316_v58 = vrot.slane %v190_v36, %v4257_v32  ;;  %v227_v59 = vcombine.low %v4287_v47, %v4292_v48  ;;  %v65_v21 = vld [vmem:[%s6105_s1 + $0x20] sm:$0xff]  ;;  %v67_v22 = vld [vmem:[%s6105_s1 + $0x30] sm:$0xff]  ;;  %v70_v27 = vld [vmem:[%s6105_s1 + $0x48] sm:$0xff] }
   0xc   :  { %v4308_v55 = vpack.i.bf16 %v4282_v46, %v4280_v45  ;;  %v259_v60 = vcombine.low %v4301_v53, %v57_v54  ;;  %v403_v3 = vrot.slane %v395_v51, %v4257_v32  ;;  %v410_v10 = vrot.slane %v396_v52, %v4257_v32  ;;  %v58_v26 = vld [vmem:[%s6104_s0 + $0x32] sm:$0x3]  ;;  %v72_v28 = vld [vmem:[%s6105_s1 + $0x58] sm:$0xff]  ;;  %v33_v30 = vld [vmem:[%s6104_s0] sm:$0x3] }
   0xd   :  { %v3995_v56 = vpack.i.bf16 %v4296_v50, %v4294_v49  ;;  %v4000_v0 = vpack.i.bf16 %v4280_v45, %v4296_v50  ;;  %v4010_v14 = vpack.i.bf16 %v4316_v58, %v4313_v57  ;;  %v4349_v15 = vrot.slane %v227_v59, %v4257_v32 }
   0xe   :  { %4006 = vrot.lane.b32.xlu1 %v4308_v55, %s4108_s15  ;;  %v4354_v16 = vrot.slane %v259_v60, %v4257_v32  ;;  %v4356_v18 = vpack.c.bf16 %v64_v62, %v62_v61  ;;  %v4358_v19 = vpack.c.bf16 %v63_v11, %v61_v63  ;;  %v4360_v20 = vpack.c.bf16 %v68_v13, %v66_v12 }
   0xf   :  { %3996 = vrot.lane.b32.xlu0 %v3995_v56, %s4109_s22  ;;  %v4369_v24 = vcombine.low %v403_v3, %v410_v10  ;;  %v4384_v29 = vpack.c.bf16 %v67_v22, %v65_v21 }
  0x10   :  { %3392 = vmatprep.subr.bf16.mxu0 %v4356_v18  ;;  %3430 = vmatprep.subr.bf16.mxu1 %v4356_v18 }
  0x11   :  { %3394 = vmatpush1.bf16.msra.mxu0 %v4358_v19  ;;  %3432 = vmatpush1.bf16.msra.mxu1 %v4358_v19 }
  0x12   :  { %267 = vrot.lane.b32.xlu1 %v4282_v46, %s4110_s29 }
  0x13   :  { %4001 = vrot.lane.b32.xlu0 %v4000_v0, %s4111_s13 }
  0x14   :  { %14 = vsyncpa [#allocation3], 0  ;;  %v4392_v35 = vpack.i.bf16 %v4354_v16, %v4349_v15  ;;  %v412_v36 = vcombine.low %v4262_v33, %v58_v26  ;;  %3396 = vmatprep.subr.bf16.mxu0 %v4360_v20  ;;  %v4396_v37 = vpack.c.bf16 %v72_v28, %v70_v27  ;;  %v69_v38 = vld [vmem:[%s6105_s1 + $0x40] sm:$0xff]  ;;  %v71_v39 = vld [vmem:[%s6105_s1 + $0x50] sm:$0xff]  ;;  %v4015_v40 = vpack.i.bf16 %v4349_v15, %v4316_v58 }
  0x15   :  { %v540_v33 = vcombine.low %v4222_v17, %v4236_v23  ;;  %v541_v41 = vcombine.low %v4244_v25, %v4255_v31  ;;  %3434 = vmatprep.subr.bf16.mxu1 %v4360_v20  ;;  %v74_v42 = vld [vmem:[%s6105_s1 + $0x68] sm:$0xff]  ;;  %v76_v43 = vld [vmem:[%s6105_s1 + $0x78] sm:$0xff]  ;;  %v4423_v44 = vrot.slane %v104_v9, %v4257_v32  ;;  %v103_v17 = vcombine.low %v33_v30, %v4175_v1  ;;  %v73_v1 = vld [vmem:[%s6105_s1 + $0x60] sm:$0xff] }
  0x16   :  { %4011 = vrot.lane.b32.xlu1 %v4010_v14, %s4109_s22  ;;  %3398 = vmatpush1.bf16.msra.mxu0 %v4384_v29  ;;  %v4428_v23 = vpack.c.bf16 %v71_v39, %v69_v38  ;;  %v120_v25 = vcombine.low %v4205_v8, %v4301_v53  ;;  %v4435_v31 = vrot.slane %v412_v36, %v4257_v32  ;;  %v75_v6 = vld [vmem:[%s6105_s1 + $0x70] sm:$0xff]  ;;  %v78_v54 = vld [vmem:[%s6105_s1 + $0x88] sm:$0xff]  ;;  %v80_v56 = vld [vmem:[%s6105_s1 + $0x98] sm:$0xff]  ;;  %vm290_vm0 = vcmask 1043456  }
  0x17   :  { %420 = vrot.lane.b32.xlu0 %v4369_v24, %s4110_s29  ;;  %3436 = vmatpush1.bf16.msra.mxu1 %v4384_v29  ;;  %v4438_v4 = vpack.c.bf16 %v76_v43, %v74_v42  ;;  %v4447_v9 = vrot.slane %v103_v17, %v4257_v32  ;;  %v548_v51 = vrot.slane %v540_v33, %v4257_v32  ;;  %v77_v0 = vld [vmem:[%s6105_s1 + $0x80] sm:$0xff]  ;;  %v79_v3 = vld [vmem:[%s6105_s1 + $0x90] sm:$0xff]  ;;  %v84_v11 = vld [vmem:[%s6105_s1 + $0xb8] sm:$0xff]  ;;  %vm4112_vm1 = vmmov 1  }
  0x18   :  { %3400 = vmatprep.subr.bf16.mxu0 %v4396_v37  ;;  %v555_v52 = vrot.slane %v541_v41, %v4257_v32  ;;  %3438 = vmatprep.subr.bf16.mxu1 %v4396_v37  ;;  %v4463_v60 = vpack.c.bf16 %v75_v6, %v73_v1  ;;  %v4030_v61 = vpack.i.bf16 %v4369_v24, %v4282_v46  ;;  %v81_v13 = vld [vmem:[%s6105_s1 + $0xa0] sm:$0xff]  ;;  %v83_v14 = vld [vmem:[%s6105_s1 + $0xb0] sm:$0xff]  ;;  %v86_v26 = vld [vmem:[%s6105_s1 + $0xc8] sm:$0xff]  ;;  %vm285_vm3 = vcmask 97280  }
  0x19   :  { %v119_v59 = vcombine.low %v4447_v9, %v4423_v44  ;;  %v681_v62 = vcombine.low %v4180_v2, %v4190_v5  ;;  %v4472_v63 = vpack.c.bf16 %v80_v56, %v78_v54  ;;  %v682_v46 = vcombine.low %v4200_v7, %v4287_v47  ;;  %v59_v2 = vld [vmem:[%s6104_s0 + $0x34] sm:$0x3]  ;;  %v82_v5 = vld [vmem:[%s6105_s1 + $0xa8] sm:$0xff]  ;;  %v88_v27 = vld [vmem:[%s6105_s1 + $0xd8] sm:$0xff] }
  0x1a   :  { %4021 = vrot.lane.b32.xlu1 %v4392_v35, %s4108_s15  ;;  %3402 = vmatpush1.bf16.msra.mxu0 %v4428_v23  ;;  %v556_v10 = vcombine.low %v548_v51, %v555_v52  ;;  %v4496_v12 = vpack.c.bf16 %v79_v3, %v77_v0  ;;  %v557_v7 = vcombine.low %v4267_v34, %v59_v2  ;;  %v85_v30 = vld [vmem:[%s6105_s1 + $0xc0] sm:$0xff]  ;;  %v87_v36 = vld [vmem:[%s6105_s1 + $0xd0] sm:$0xff]  ;;  %v92_v33 = vld [vmem:[%s6105_s1 + $0xf8] sm:$0xff]  ;;  %vm273_vm4 = vcmask 228352  }
  0x1b   :  { %4016 = vrot.lane.b32.xlu0 %v4015_v40, %s4111_s13  ;;  %3440 = vmatpush1.bf16.msra.mxu1 %v4428_v23  ;;  %v4501_v47 = vpack.c.bf16 %v84_v11, %v82_v5  ;;  %v689_v22 = vrot.slane %v681_v62, %v4257_v32  ;;  %v696_v34 = vrot.slane %v682_v46, %v4257_v32  ;;  %v60_v39 = vld [vmem:[%s6104_s0 + $0x36] sm:$0x3]  ;;  %v90_v40 = vld [vmem:[%s6105_s1 + $0xe8] sm:$0xff]  ;;  %v89_v1 = vld [vmem:[%s6105_s1 + $0xe0] sm:$0xff]  ;;  %vm276_vm5 = vcmask 457728  }
  0x1c   :  { %3404 = vmatprep.subr.bf16.mxu0 %v4438_v4  ;;  %3442 = vmatprep.subr.bf16.mxu1 %v4438_v4  ;;  %v4035_v21 = vpack.i.bf16 %v556_v10, %v4369_v24  ;;  %v564_v24 = vrot.slane %v557_v7, %v4257_v32  ;;  %v4528_v28 = vpack.c.bf16 %v88_v27, %v86_v26  ;;  %v91_v6 = vld [vmem:[%s6105_s1 + $0xf0] sm:$0xff]  ;;  %v96_v51 = vld [vmem:[%s6105_s1 + $0x118] sm:$0xf]  ;;  %v93_v54 = vld [vmem:[%s6105_s1 + $0x100] sm:$0xff]  ;;  %vm279_vm6 = vcmask 687104  }
  0x1d   :  { %v697_v38 = vcombine.low %v689_v22, %v696_v34  ;;  %v4549_v41 = vpack.c.bf16 %v87_v36, %v85_v30  ;;  %v698_v43 = vcombine.low %v4292_v48, %v60_v39  ;;  %v4556_v17 = vpack.c.bf16 %v92_v33, %v90_v40  ;;  %v94_v48 = vld [vmem:[%s6105_s1 + $0x108] sm:$0xff]  ;;  %v95_v56 = vld [vmem:[%s6105_s1 + $0x110] sm:$0xf]  ;;  %vm4591_vm2 = vmpackc.low %vm290_vm0, %vm4112_vm1 }
  0x1e   :  { %422 = vrot.lane.b32.xlu1 %v4435_v31, %s4110_s29  ;;  %3406 = vmatpush1.bf16.msra.mxu0 %v4463_v60  ;;  %v4050_v42 = vpack.i.bf16 %v564_v24, %v4435_v31  ;;  %v4576_v52 = vpack.c.bf16 %v91_v6, %v89_v1  ;;  %v4597_v62 = vpack.c.bf16 %v95_v56, %v93_v54  ;;  %vm282_vm7 = vcmask 916480  }
  0x1f   :  { %269 = vrot.lane.b32.xlu0 %v4354_v16, %s4110_s29  ;;  %3444 = vmatpush1.bf16.msra.mxu1 %v4463_v60  ;;  %v127_v22 = vrot.slane %v120_v25, %v4257_v32  ;;  %vm4114_vm8 = vmmov 0   ;;  %vm2260_vm9 = vcmask 261120   ;;  %vm2310_vm10 = vcmask 523264  }
  0x20   :  { %3408 = vmatprep.subr.bf16.mxu0 %v4472_v63  ;;  %3446 = vmatprep.subr.bf16.mxu1 %v4472_v63  ;;  %vm2258_vm11 = vcmask 654336   ;;  %vm2542_vm12 = vcmask 1041408  }
  0x22   :  { %4031 = vrot.lane.b32.xlu1 %v4030_v61, %s4111_s13  ;;  %3410 = vmatpush1.bf16.msra.mxu0 %v4496_v12 }
  0x23   :  { %4026 = vrot.lane.b32.xlu0 %v4308_v55, %s4109_s22  ;;  %3448 = vmatpush1.bf16.msra.mxu1 %v4496_v12  ;;  %v4523_v55 = vpack.c.bf16 %v83_v14, %v81_v13 }
  0x24   :  { %3412 = vmatprep.subr.bf16.mxu0 %v4501_v47  ;;  %3450 = vmatprep.subr.bf16.mxu1 %v4501_v47 }
  0x26   :  { %565 = vrot.lane.b32.xlu1 %v556_v10, %s4110_s29  ;;  %3414 = vmatpush1.bf16.msra.mxu0 %v4523_v55 }
  0x27   :  { %4036 = vrot.lane.b32.xlu0 %v4035_v21, %s4108_s15  ;;  %3452 = vmatpush1.bf16.msra.mxu1 %v4523_v55 }
  0x28   :  { %3416 = vmatprep.subr.bf16.mxu0 %v4528_v28  ;;  %3454 = vmatprep.subr.bf16.mxu1 %v4528_v28 }
  0x2a   :  { %4041 = vrot.lane.b32.xlu1 %v4392_v35, %s4109_s22  ;;  %v4045_v35 = vpack.i.bf16 %v4435_v31, %v4354_v16  ;;  %3418 = vmatpush1.bf16.msra.mxu0 %v4549_v41  ;;  %v705_v16 = vrot.slane %v698_v43, %v4257_v32  ;;  %v4581_v31 = vpack.c.bf16 %v96_v51, %v94_v48 }
  0x2b   :  { %706 = vrot.lane.b32.xlu0 %v697_v38, %s4110_s29  ;;  %3456 = vmatpush1.bf16.msra.mxu1 %v4549_v41 }
  0x2c   :  { %3420 = vmatprep.subr.bf16.mxu0 %v4556_v17  ;;  %3458 = vmatprep.subr.bf16.mxu1 %v4556_v17 }
  0x2e   :  { %4051 = vrot.lane.b32.xlu1 %v4050_v42, %s4108_s15  ;;  %3422 = vmatpush1.bf16.msra.mxu0 %v4576_v52 }
  0x2f   :  { %4046 = vrot.lane.b32.xlu0 %v4045_v35, %s4111_s13  ;;  %3460 = vmatpush1.bf16.msra.mxu1 %v4576_v52  ;;  %s4117_s13 = smov 32  }
  0x30   :  { %3425 = vmatprep.subr.msk.bf16.mxu0 %vm4591_vm2, %v4581_v31  ;;  %3463 = vmatprep.subr.msk.bf16.mxu1 %vm4591_vm2, %v4581_v31 }
  0x32   :  { %708 = vrot.lane.b32.xlu1 %v705_v16, %s4110_s29  ;;  %3428 = vmatpush1.bf16.msk.msra.mxu0 %vm4591_vm2, %v4597_v62 }
  0x33   :  { %567 = vrot.lane.b32.xlu0 %v564_v24, %s4110_s29  ;;  %3466 = vmatpush1.bf16.msk.msra.mxu1 %vm4591_vm2, %v4597_v62 }
  0x34   :  { %3468 = vmatprep.subr.bf16.mxu0 %v4356_v18  ;;  %3506 = vmatprep.subr.bf16.mxu1 %v4356_v18 }
  0x80   :  { %v4007_v0 = vpop.permute.xlu1 %4006 }
  0x81   :  { %v3997_v3 = vpop.permute.xlu0 %3996  ;;  %v4009_v5 = vunpack.i.h.bf16 %v4007_v0  ;;  %v4008_v11 = vunpack.i.l.bf16 %v4007_v0 }
  0x82   :  { %v3999_v10 = vunpack.i.h.bf16 %v3997_v3  ;;  %v3998_v46 = vunpack.i.l.bf16 %v3997_v3 }
  0x84   :  { %v268_v2 = vpop.permute.xlu1 %267  ;;  %v426_v21 = vsel %vm273_vm4, %v4294_v49, %v3999_v10  ;;  %v274_v18 = vsel %vm273_vm4, %v119_v59, %v3998_v46 }
  0x85   :  { %v4002_v7 = vpop.permute.xlu0 %4001  ;;  %2572 = vmatprep.mubr.msk.f32.mxu0 %vm285_vm3, %v268_v2 }
  0x86   :  { %v4004_v13 = vunpack.i.h.bf16 %v4002_v7  ;;  %v4003_v14 = vunpack.i.l.bf16 %v4002_v7 }
  0x88   :  { %v4012_v34 = vpop.permute.xlu1 %4011  ;;  %v277_v26 = vsel %vm276_vm5, %v274_v18, %v4003_v14  ;;  %v428_v27 = vsel %vm276_vm5, %v426_v21, %v4004_v13 }
  0x89   :  { %v4014_v24 = vunpack.i.h.bf16 %v4012_v34  ;;  %v4013_v30 = vunpack.i.l.bf16 %v4012_v34  ;;  %v421_v36 = vpop.permute.xlu0 %420  ;;  %v280_v49 = vsel %vm279_vm6, %v277_v26, %v4008_v11  ;;  %v430_v44 = vsel %vm279_vm6, %v428_v27, %v4009_v5  ;;  %v987_v27 = vld [vmem:[%s6107_s3 + $0x88] sm:$0xff] }
  0x8a   :  { %2576 = vmatprep.mubr.msk.f32.mxu1 %vm285_vm3, %v421_v36  ;;  %v283_v9 = vsel %vm282_vm7, %v280_v49, %v268_v2  ;;  %v432_v59 = vsel %vm282_vm7, %v430_v44, %v421_v36  ;;  %v1019_v36 = vld [vmem:[%s6107_s3 + $0x188] sm:$0xff]  ;;  %v970_v49 = vld [vmem:[%s6107_s3] sm:$0xff] }
  0x8b   :  { %362 = vmatmul.mubr.f32.vlgmr.msra.gmra.mrb[0].mxu0 %v283_v9  ;;  %503 = vmatmul.mubr.f32.vlgmr.msra.gmra.mrb[0].mxu1 %v432_v59  ;;  %v427_v53 = vsel %vm273_vm4, %v4313_v57, %v4014_v24  ;;  %v275_v25 = vsel %vm273_vm4, %v127_v22, %v4013_v30  ;;  %v1018_v24 = vld [vmem:[%s6107_s3 + $0x180] sm:$0xff]  ;;  %v971_v44 = vld [vmem:[%s6107_s3 + $0x8] sm:$0xff] }
  0x8c   :  { %3470 = vmatpush1.bf16.msra.mxu0 %v4358_v19  ;;  %3508 = vmatpush1.bf16.msra.mxu1 %v4358_v19  ;;  %v4022_v8 = vpop.permute.xlu1 %4021  ;;  %v3575_v9 = vpack.c.bf16 %v1019_v36, %v1018_v24  ;;  %v3545_v59 = vpack.c.bf16 %v971_v44, %v970_v49  ;;  %v980_v24 = vld [vmem:[%s6107_s3 + $0x50] sm:$0xff] }
  0x8d   :  { %v4024_v38 = vunpack.i.h.bf16 %v4022_v8  ;;  %v4023_v39 = vunpack.i.l.bf16 %v4022_v8  ;;  %v4017_v40 = vpop.permute.xlu0 %4016  ;;  %3472 = vmatprep.subr.bf16.mxu0 %v4360_v20  ;;  %3510 = vmatprep.subr.bf16.mxu1 %v4360_v20  ;;  %v1002_v8 = vld [vmem:[%s6107_s3 + $0x100] sm:$0xff]  ;;  %v1012_v44 = vld [vmem:[%s6107_s3 + $0x150] sm:$0xff] }
  0x8e   :  { %v4019_v33 = vunpack.i.h.bf16 %v4017_v40  ;;  %v4018_v42 = vunpack.i.l.bf16 %v4017_v40  ;;  %v1020_v40 = vld [vmem:[%s6107_s3 + $0x190] sm:$0xff] }
  0x90   :  { %3474 = vmatpush1.bf16.msra.mxu0 %v4384_v29  ;;  %3512 = vmatpush1.bf16.msra.mxu1 %v4384_v29  ;;  %v423_v19 = vpop.permute.xlu1 %422  ;;  %v278_v43 = vsel %vm276_vm5, %v275_v25, %v4018_v42  ;;  %v429_v57 = vsel %vm276_vm5, %v427_v53, %v4019_v33  ;;  %v1003_v53 = vld [vmem:[%s6107_s3 + $0x108] sm:$0xff]  ;;  %v988_v25 = vld [vmem:[%s6107_s3 + $0x90] sm:$0xff]  ;;  %v1021_v33 = vld [vmem:[%s6107_s3 + $0x198] sm:$0xff] }
  0x91   :  { %v270_v1 = vpop.permute.xlu0 %269  ;;  %2577 = vmatprep.mubr.msk.f32.mxu1 %vm285_vm3, %v423_v19  ;;  %3476 = vmatprep.subr.bf16.mxu0 %v4396_v37  ;;  %v281_v6 = vsel %vm279_vm6, %v278_v43, %v4023_v39  ;;  %v431_v20 = vsel %vm279_vm6, %v429_v57, %v4024_v38  ;;  %v3577_v38 = vpack.c.bf16 %v1003_v53, %v1002_v8  ;;  %v989_v39 = vld [vmem:[%s6107_s3 + $0x98] sm:$0xff]  ;;  %v972_v43 = vld [vmem:[%s6107_s3 + $0x10] sm:$0xff]  ;;  %v998_v8 = vld [vmem:[%s6107_s3 + $0xe0] sm:$0xff] }
  0x92   :  { %2573 = vmatprep.mubr.msk.f32.mxu0 %vm285_vm3, %v270_v1  ;;  %3514 = vmatprep.subr.bf16.mxu1 %v4396_v37  ;;  %v284_v29 = vsel %vm282_vm7, %v281_v6, %v270_v1  ;;  %v433_v35 = vsel %vm282_vm7, %v431_v20, %v423_v19  ;;  %v3547_v42 = vpack.c.bf16 %v989_v39, %v988_v25  ;;  %v973_v57 = vld [vmem:[%s6107_s3 + $0x18] sm:$0xff]  ;;  %v1004_v1 = vld [vmem:[%s6107_s3 + $0x110] sm:$0xff]  ;;  %v999_v53 = vld [vmem:[%s6107_s3 + $0xe8] sm:$0xff] }
  0x93   :  { %368 = vmatmul.mubr.f32.gmra.mrb[2].mxu0 %v284_v29  ;;  %509 = vmatmul.mubr.f32.gmra.mrb[2].mxu1 %v433_v35  ;;  %v3579_v19 = vpack.c.bf16 %v1021_v33, %v1020_v40  ;;  %v3549_v6 = vpack.c.bf16 %v973_v57, %v972_v43  ;;  %v1005_v20 = vld [vmem:[%s6107_s3 + $0x118] sm:$0xff]  ;;  %v990_v29 = vld [vmem:[%s6107_s3 + $0xa0] sm:$0xff]  ;;  %v991_v35 = vld [vmem:[%s6107_s3 + $0xa8] sm:$0xff] }
  0x94   :  { %3478 = vmatpush1.bf16.msra.mxu0 %v4428_v23  ;;  %3516 = vmatpush1.bf16.msra.mxu1 %v4428_v23  ;;  %v4032_v48 = vpop.permute.xlu1 %4031  ;;  %v1030_v25 = vld [vmem:[%s6107_s3 + $0x1e0] sm:$0xff]  ;;  %v1031_v39 = vld [vmem:[%s6107_s3 + $0x1e8] sm:$0xff] }
  0x95   :  { %3480 = vmatprep.subr.bf16.mxu0 %v4438_v4  ;;  %3518 = vmatprep.subr.bf16.mxu1 %v4438_v4  ;;  %v4027_v51 = vpop.permute.xlu0 %4026  ;;  %v4034_v0 = vunpack.i.h.bf16 %v4032_v48  ;;  %v4033_v3 = vunpack.i.l.bf16 %v4032_v48  ;;  %v3581_v48 = vpack.c.bf16 %v1005_v20, %v1004_v1  ;;  %v982_v40 = vld [vmem:[%s6107_s3 + $0x60] sm:$0xff]  ;;  %v983_v33 = vld [vmem:[%s6107_s3 + $0x68] sm:$0xff]  ;;  %v1001_v20 = vld [vmem:[%s6107_s3 + $0xf8] sm:$0xff] }
  0x96   :  { %v1014_v43 = vld [vmem:[%s6107_s3 + $0x160] sm:$0xff]  ;;  %v1015_v57 = vld [vmem:[%s6107_s3 + $0x168] sm:$0xff] }
  0x97   :  { %v3601_v1 = vpack.c.bf16 %v1015_v57, %v1014_v43 }
  0x98   :  { %3482 = vmatpush1.bf16.msra.mxu0 %v4463_v60  ;;  %3520 = vmatpush1.bf16.msra.mxu1 %v4463_v60  ;;  %v566_v16 = vpop.permute.xlu1 %565  ;;  %v4029_v60 = vunpack.i.h.bf16 %v4027_v51 }
  0x99   :  { %3484 = vmatprep.subr.bf16.mxu0 %v4472_v63  ;;  %3522 = vmatprep.subr.bf16.mxu1 %v4472_v63  ;;  %v4037_v37 = vpop.permute.xlu0 %4036  ;;  %v4028_v63 = vunpack.i.l.bf16 %v4027_v51  ;;  %v3551_v51 = vpack.c.bf16 %v991_v35, %v990_v29  ;;  %v1032_v29 = vld [vmem:[%s6107_s3 + $0x1f0] sm:$0xff] }
  0x9a   :  { %2580 = vmatprep.mubr.msk.f32.mxu0 %vm285_vm3, %v566_v16  ;;  %v4039_v2 = vunpack.i.h.bf16 %v4037_v37  ;;  %v4038_v5 = vunpack.i.l.bf16 %v4037_v37  ;;  %v1022_v37 = vld [vmem:[%s6107_s3 + $0x1a0] sm:$0xff] }
  0x9c   :  { %3486 = vmatpush1.bf16.msra.mxu0 %v4496_v12  ;;  %3524 = vmatpush1.bf16.msra.mxu1 %v4496_v12  ;;  %v4042_v4 = vpop.permute.xlu1 %4041 }
  0x9d   :  { %3488 = vmatprep.subr.bf16.mxu0 %v4501_v47  ;;  %3526 = vmatprep.subr.bf16.mxu1 %v4501_v47  ;;  %v707_v23 = vpop.permute.xlu0 %706  ;;  %v4044_v54 = vunpack.i.h.bf16 %v4042_v4  ;;  %v4043_v12 = vunpack.i.l.bf16 %v4042_v4  ;;  %v712_v47 = vsel %vm273_vm4, %v4280_v45, %v4029_v60  ;;  %v975_v60 = vld [vmem:[%s6107_s3 + $0x28] sm:$0xff] }
  0x9e   :  { %2584 = vmatprep.mubr.msk.f32.mxu1 %vm285_vm3, %v707_v23  ;;  %v714_v7 = vsel %vm276_vm5, %v712_v47, %v4034_v0  ;;  %v992_v0 = vld [vmem:[%s6107_s3 + $0xb0] sm:$0xff] }
  0x9f   :  { %v713_v11 = vsel %vm273_vm4, %v4349_v15, %v4044_v54  ;;  %v716_v14 = vsel %vm279_vm6, %v714_v7, %v4039_v2  ;;  %v1007_v54 = vld [vmem:[%s6107_s3 + $0x128] sm:$0xff]  ;;  %v1024_v47 = vld [vmem:[%s6107_s3 + $0x1b0] sm:$0xff]  ;;  %v994_v7 = vld [vmem:[%s6107_s3 + $0xc0] sm:$0xff] }
  0xa0   :  { %3490 = vmatpush1.bf16.msra.mxu0 %v4523_v55  ;;  %3528 = vmatpush1.bf16.msra.mxu1 %v4523_v55  ;;  %v571_v55 = vsel %vm273_vm4, %v4296_v50, %v4028_v63  ;;  %v718_v34 = vsel %vm282_vm7, %v716_v14, %v707_v23  ;;  %v974_v23 = vld [vmem:[%s6107_s3 + $0x20] sm:$0xff]  ;;  %v979_v14 = vld [vmem:[%s6107_s3 + $0x48] sm:$0xff] }
  0xa1   :  { %3492 = vmatprep.subr.bf16.mxu0 %v4528_v28  ;;  %3530 = vmatprep.subr.bf16.mxu1 %v4528_v28  ;;  %v4047_v56 = vpop.permute.xlu0 %4046  ;;  %v4052_v28 = vpop.permute.xlu1 %4051  ;;  %v573_v45 = vsel %vm276_vm5, %v571_v55, %v4033_v3  ;;  %v1006_v63 = vld [vmem:[%s6107_s3 + $0x120] sm:$0xff]  ;;  %v993_v3 = vld [vmem:[%s6107_s3 + $0xb8] sm:$0xff] }
  0xa2   :  { %v4049_v10 = vunpack.i.h.bf16 %v4047_v56  ;;  %v4048_v46 = vunpack.i.l.bf16 %v4047_v56  ;;  %v4054_v50 = vunpack.i.h.bf16 %v4052_v28  ;;  %v4053_v15 = vunpack.i.l.bf16 %v4052_v28  ;;  %v1025_v28 = vld [vmem:[%s6107_s3 + $0x1b8] sm:$0xff] }
  0xa3   :  { %v575_v13 = vsel %vm279_vm6, %v573_v45, %v4038_v5  ;;  %v3585_v56 = vpack.c.bf16 %v1007_v54, %v1006_v63  ;;  %v3555_v55 = vpack.c.bf16 %v993_v3, %v992_v0  ;;  %v3587_v2 = vpack.c.bf16 %v1025_v28, %v1024_v47  ;;  %v1050_v54 = vld [vmem:[%s6107_s3 + $0x280] sm:$0xff]  ;;  %v2604_v3 = vld [vmem:[%s6107_s3 + $0x388] sm:$0xff] }
  0xa4   :  { %3494 = vmatpush1.bf16.msra.mxu0 %v4549_v41  ;;  %3532 = vmatpush1.bf16.msra.mxu1 %v4549_v41  ;;  %v572_v41 = vsel %vm273_vm4, %v4316_v58, %v4043_v12  ;;  %v577_v22 = vsel %vm282_vm7, %v575_v13, %v566_v16  ;;  %v1023_v16 = vld [vmem:[%s6107_s3 + $0x1a8] sm:$0xff]  ;;  %v3553_v12 = vpack.c.bf16 %v975_v60, %v974_v23  ;;  %v978_v13 = vld [vmem:[%s6107_s3 + $0x40] sm:$0xff]  ;;  %v1017_v60 = vld [vmem:[%s6107_s3 + $0x178] sm:$0xff] }
  0xa5   :  { %3496 = vmatprep.subr.bf16.mxu0 %v4556_v17  ;;  %3534 = vmatprep.subr.bf16.mxu1 %v4556_v17  ;;  %v574_v58 = vsel %vm276_vm5, %v572_v41, %v4048_v46  ;;  %v715_v17 = vsel %vm276_vm5, %v713_v11, %v4049_v10  ;;  %v3583_v4 = vpack.c.bf16 %v1023_v16, %v1022_v37  ;;  %v976_v10 = vld [vmem:[%s6107_s3 + $0x30] sm:$0xff]  ;;  %v977_v46 = vld [vmem:[%s6107_s3 + $0x38] sm:$0xff] }
  0xa6   :  { %v576_v21 = vsel %vm279_vm6, %v574_v58, %v4053_v15  ;;  %v717_v18 = vsel %vm279_vm6, %v715_v17, %v4054_v50  ;;  %v3557_v5 = vpack.c.bf16 %v977_v46, %v976_v10  ;;  %v1008_v11 = vld [vmem:[%s6107_s3 + $0x130] sm:$0xff]  ;;  %v1009_v41 = vld [vmem:[%s6107_s3 + $0x138] sm:$0xff]  ;;  %v995_v50 = vld [vmem:[%s6107_s3 + $0xc8] sm:$0xff] }
  0xa7   :  { %v3589_v45 = vpack.c.bf16 %v1009_v41, %v1008_v11  ;;  %v1026_v15 = vld [vmem:[%s6107_s3 + $0x1c0] sm:$0xff]  ;;  %v3559_v58 = vpack.c.bf16 %v995_v50, %v994_v7  ;;  %v1027_v17 = vld [vmem:[%s6107_s3 + $0x1c8] sm:$0xff]  ;;  %v985_v37 = vld [vmem:[%s6107_s3 + $0x78] sm:$0xff] }
  0xa8   :  { %3498 = vmatpush1.bf16.msra.mxu0 %v4576_v52  ;;  %3536 = vmatpush1.bf16.msra.mxu1 %v4576_v52  ;;  %v709_v52 = vpop.permute.xlu1 %708  ;;  %v2586_v11 = vld [vmem:[%s6106_s2] ss:$0 sm:$0xff] }
  0xa9   :  { %3501 = vmatprep.subr.msk.bf16.mxu0 %vm4591_vm2, %v4581_v31  ;;  %3539 = vmatprep.subr.msk.bf16.mxu1 %vm4591_vm2, %v4581_v31  ;;  %v568_v31 = vpop.permute.xlu0 %567  ;;  %v719_v61 = vsel %vm282_vm7, %v717_v18, %v709_v52  ;;  %v1011_v18 = vld [vmem:[%s6107_s3 + $0x148] sm:$0xff] }
  0xaa   :  { %v578_v26 = vsel %vm282_vm7, %v576_v21, %v568_v31  ;;  %v1010_v21 = vld [vmem:[%s6107_s3 + $0x140] sm:$0xff] }
  0xac   :  { %3504 = vmatpush1.bf16.msk.msra.mxu0 %vm4591_vm2, %v4597_v62  ;;  %3542 = vmatpush1.bf16.msk.msra.mxu1 %vm4591_vm2, %v4597_v62  ;;  %v986_v62 = vld [vmem:[%s6107_s3 + $0x80] sm:$0xff] }
  0xad   :  { %v3543_v30 = vpack.c.bf16 %v987_v27, %v986_v62  ;;  %3576 = vmatprep.subr.bf16.mxu1 %v3575_v9  ;;  %v1029_v27 = vld [vmem:[%s6107_s3 + $0x1d8] sm:$0xff] }
  0xae   :  { %v1013_v9 = vld [vmem:[%s6107_s3 + $0x158] sm:$0xff] }
  0xaf   :  { %648 = vmatmul.mubr.f32.vlgmr.msra.gmra.mrb[4].mxu0 %v577_v22  ;;  %789 = vmatmul.mubr.f32.vlgmr.msra.gmra.mrb[4].mxu1 %v718_v34  ;;  %v3593_v22 = vpack.c.bf16 %v1011_v18, %v1010_v21  ;;  %v996_v34 = vld [vmem:[%s6107_s3 + $0xd0] sm:$0xff] }
  0xb0   :  { %2581 = vmatprep.mubr.msk.f32.mxu0 %vm285_vm3, %v568_v31  ;;  %2585 = vmatprep.mubr.msk.f32.mxu1 %vm285_vm3, %v709_v52  ;;  %v3591_v52 = vpack.c.bf16 %v1027_v17, %v1026_v15  ;;  %v3561_v31 = vpack.c.bf16 %v979_v14, %v978_v13 }
  0xb1   :  { %3544 = vmatprep.subr.bf16.mxu0 %v3543_v30  ;;  %3578 = vmatpush3.bf16.msra.mxu1 %v3577_v38  ;;  %v981_v30 = vld [vmem:[%s6107_s3 + $0x58] sm:$0xff]  ;;  %v3567_v38 = vpack.c.bf16 %v999_v53, %v998_v8 }
  0xb2   :  { %3546 = vmatpush3.bf16.msra.mxu0 %v3545_v59  ;;  %3580 = vmatprep.subr.bf16.mxu1 %v3579_v19  ;;  %v3565_v49 = vpack.c.bf16 %v981_v30, %v980_v24  ;;  %v3597_v59 = vpack.c.bf16 %v1013_v9, %v1012_v44  ;;  %v3569_v19 = vpack.c.bf16 %v983_v33, %v982_v40 }
  0xb3   :  { %654 = vmatmul.mubr.f32.gmra.mrb[6].mxu0 %v578_v26  ;;  %795 = vmatmul.mubr.f32.gmra.mrb[6].mxu1 %v719_v61  ;;  %v997_v26 = vld [vmem:[%s6107_s3 + $0xd8] sm:$0xff]  ;;  %v1028_v61 = vld [vmem:[%s6107_s3 + $0x1d0] sm:$0xff] }
  0xb4   :  { %3548 = vmatprep.subr.bf16.mxu0 %v3547_v42  ;;  %v3563_v62 = vpack.c.bf16 %v997_v26, %v996_v34  ;;  %v3595_v36 = vpack.c.bf16 %v1029_v27, %v1028_v61  ;;  %v3599_v42 = vpack.c.bf16 %v1031_v39, %v1030_v25 }
  0xb5   :  { %3582 = vmatpush3.bf16.msra.mxu1 %v3581_v48  ;;  %v1033_v48 = vld [vmem:[%s6107_s3 + $0x1f8] sm:$0xff] }
  0xb6   :  { %3550 = vmatpush3.bf16.msra.mxu0 %v3549_v6  ;;  %3584 = vmatprep.subr.bf16.mxu1 %v3583_v4  ;;  %v1000_v6 = vld [vmem:[%s6107_s3 + $0xf0] sm:$0xff]  ;;  %v3603_v16 = vpack.c.bf16 %v1033_v48, %v1032_v29 }
  0xb7   :  { %3552 = vmatprep.subr.bf16.mxu0 %v3551_v51  ;;  %v3571_v35 = vpack.c.bf16 %v1001_v20, %v1000_v6  ;;  %v984_v51 = vld [vmem:[%s6107_s3 + $0x70] sm:$0xff] }
  0xb8   :  { %v3573_v23 = vpack.c.bf16 %v985_v37, %v984_v51  ;;  %v1016_v4 = vld [vmem:[%s6107_s3 + $0x170] sm:$0xff] }
  0xb9   :  { %3586 = vmatpush3.bf16.msra.mxu1 %v3585_v56  ;;  %v3605_v63 = vpack.c.bf16 %v1017_v60, %v1016_v4  ;;  %v2603_v56 = vld [vmem:[%s6107_s3 + $0x380] sm:$0xff] }
  0xba   :  { %3554 = vmatpush3.bf16.msra.mxu0 %v3553_v12  ;;  %3588 = vmatprep.subr.bf16.mxu1 %v3587_v2  ;;  %v1051_v12 = vld [vmem:[%s6107_s3 + $0x288] sm:$0xff]  ;;  %v3639_v47 = vpack.c.bf16 %v2604_v3, %v2603_v56 }
  0xbb   :  { %3556 = vmatprep.subr.bf16.mxu0 %v3555_v55  ;;  %v3607_v0 = vpack.c.bf16 %v1051_v12, %v1050_v54 }
  0xbd   :  { %3590 = vmatpush3.bf16.msra.mxu1 %v3589_v45 }
  0xbe   :  { %3558 = vmatpush3.bf16.msra.mxu0 %v3557_v5  ;;  %3592 = vmatprep.subr.bf16.mxu1 %v3591_v52 }
  0xbf   :  { %3560 = vmatprep.subr.bf16.mxu0 %v3559_v58 }
  0xc1   :  { %3594 = vmatpush3.bf16.msra.mxu1 %v3593_v22 }
  0xc2   :  { %3562 = vmatpush3.bf16.msra.mxu0 %v3561_v31  ;;  %3596 = vmatprep.subr.bf16.mxu1 %v3595_v36 }
  0xc3   :  { %3564 = vmatprep.subr.bf16.mxu0 %v3563_v62 }
  0xc5   :  { %3598 = vmatpush3.bf16.msra.mxu1 %v3597_v59 }
  0xc6   :  { %3566 = vmatpush3.bf16.msra.mxu0 %v3565_v49  ;;  %3600 = vmatprep.subr.bf16.mxu1 %v3599_v42 }
  0xc7   :  { %3568 = vmatprep.subr.bf16.mxu0 %v3567_v38 }
  0xc9   :  { %3602 = vmatpush3.bf16.msra.mxu1 %v3601_v1 }
  0xca   :  { %3570 = vmatpush3.bf16.msra.mxu0 %v3569_v19  ;;  %3604 = vmatprep.subr.bf16.mxu1 %v3603_v16 }
  0xcb   :  { %3572 = vmatprep.subr.bf16.mxu0 %v3571_v35 }
  0xcd   :  { %3606 = vmatpush3.bf16.msra.mxu1 %v3605_v63 }
  0xce   :  { %3574 = vmatpush3.bf16.msra.mxu0 %v3573_v23  ;;  %3640 = vmatprep.subr.bf16.mxu1 %v3639_v47 }
  0xcf   :  { %3608 = vmatprep.subr.bf16.mxu0 %v3607_v0 }
 0x15e   :  { %v363_v55 = vpop.f32.mrb[0].mxu0  ;;  %v504_v28 = vpop.f32.mrb[0].mxu1 }
 0x15f   :  { %v515_v10 = vmax.f32 %v363_v55, %v504_v28  ;;  %v365_v46 = vpop.f32.mrb[1].mxu0  ;;  %v506_v2 = vpop.f32.mrb[1].mxu1 }
 0x160   :  { %v516_v5 = vmax.f32 %v365_v46, %v506_v2  ;;  %v1034_v46 = vld [vmem:[%s6107_s3 + $0x200] sm:$0xff]  ;;  %v1035_v2 = vld [vmem:[%s6107_s3 + $0x208] sm:$0xff] }
 0x162   :  { %v806_v41 = vmax.f32 %v515_v10, %v516_v5 }
 0x164   :  { %v814_v45 = vadd.f32 %v2586_v11, %v806_v41  ;;  %v2588_v41 = vld [vmem:[%s6107_s3 + $0x308] sm:$0xff] }
 0x166   :  { %v816_v7 = vmax.f32 %v814_v45, 0.0  ;;  %v369_v50 = vpop.f32.mrb[2].mxu0  ;;  %v510_v15 = vpop.f32.mrb[2].mxu1 }
 0x167   :  { %v517_v58 = vmax.f32 %v369_v50, %v510_v15  ;;  %v371_v17 = vpop.f32.mrb[3].mxu0  ;;  %v512_v13 = vpop.f32.mrb[3].mxu1 }
 0x168   :  { %v820_v14 = vcombine.high %v816_v7, %v816_v7  ;;  %v827_v52 = vrot.slane %v816_v7, %v4257_v32  ;;  %v518_v31 = vmax.f32 %v371_v17, %v512_v13  ;;  %v3609_v13 = vpack.c.bf16 %v1035_v2, %v1034_v46  ;;  %v2595_v46 = vld [vmem:[%s6107_s3 + $0x340] sm:$0xff]  ;;  %v2596_v2 = vld [vmem:[%s6107_s3 + $0x348] sm:$0xff] }
 0x16a   :  { %v834_v21 = vrot.slane %v820_v14, %v4257_v32  ;;  %v807_v18 = vmax.f32 %v517_v58, %v518_v31  ;;  %v835_v22 = vcombine.high %v827_v52, %v827_v52  ;;  %v1052_v58 = vld [vmem:[%s6107_s3 + $0x290] sm:$0xff]  ;;  %v1053_v14 = vld [vmem:[%s6107_s3 + $0x298] sm:$0xff] }
 0x16b   :  { %v2606_v31 = vld [vmem:[%s6107_s3 + $0x398] sm:$0xff] }
 0x16c   :  { %v815_v34 = vadd.f32 %v2586_v11, %v807_v18  ;;  %v836_v26 = vcombine.high %v834_v21, %v834_v21  ;;  %v914_v62 = vcombine.low %v835_v22, %v834_v21  ;;  %v878_v47 = vcombine.low %v827_v52, %v835_v22  ;;  %v2605_v52 = vld [vmem:[%s6107_s3 + $0x390] sm:$0xff] }
 0x16e   :  { %v817_v61 = vmax.f32 %v815_v34, 0.0  ;;  %v879_v24 = vcombine.low %v834_v21, %v836_v26  ;;  %v922_v49 = vrot.slane %v914_v62, %v4257_v32  ;;  %v886_v17 = vrot.slane %v878_v47, %v4257_v32  ;;  %v1042_v47 = vld [vmem:[%s6107_s3 + $0x240] sm:$0xff] }
 0x170   :  { %v843_v27 = vrot.slane %v817_v61, %v4257_v32  ;;  %v893_v59 = vrot.slane %v879_v24, %v4257_v32  ;;  %v1037_v61 = vld [vmem:[%s6107_s3 + $0x218] sm:$0xff] }
 0x171   :  { %v2590_v24 = vld [vmem:[%s6107_s3 + $0x318] sm:$0xff] }
 0x172   :  { %v844_v30 = vcombine.high %v843_v27, %v843_v27  ;;  %v915_v36 = vcombine.low %v836_v26, %v843_v27  ;;  %v1036_v26 = vld [vmem:[%s6107_s3 + $0x210] sm:$0xff]  ;;  %v4971_v62 = vcombine.low %v886_v17, %v893_v59 }
 0x174   :  { %v929_v44 = vrot.slane %v915_v36, %v4257_v32  ;;  %v950_v9 = vcombine.low %v843_v27, %v844_v30  ;;  %v2589_v27 = vld [vmem:[%s6107_s3 + $0x310] sm:$0xff]  ;;  %v1054_v30 = vld [vmem:[%s6107_s3 + $0x2a0] sm:$0xff] }
 0x176   :  { %v4923_v8 = vcombine.low %v922_v49, %v929_v44  ;;  %v957_v53 = vrot.slane %v950_v9, %v4257_v32  ;;  %v3611_v49 = vpack.c.bf16 %v1053_v14, %v1052_v58  ;;  %v3643_v44 = vpack.c.bf16 %v2606_v31, %v2605_v52  ;;  %v1055_v9 = vld [vmem:[%s6107_s3 + $0x2a8] sm:$0xff]  ;;  %v1045_v58 = vld [vmem:[%s6107_s3 + $0x258] sm:$0xff]  ;;  %v2597_v14 = vld [vmem:[%s6107_s3 + $0x350] sm:$0xff] }
 0x177   :  { %v2598_v52 = vld [vmem:[%s6107_s3 + $0x358] sm:$0xff]  ;;  %v1062_v31 = vld [vmem:[%s6107_s3 + $0x2e0] sm:$0xff] }
 0x178   :  { %v4926_v25 = vcombine.low %v893_v59, %v957_v53  ;;  %v2607_v59 = vld [vmem:[%s6107_s3 + $0x3a0] sm:$0xff]  ;;  %v2608_v53 = vld [vmem:[%s6107_s3 + $0x3a8] sm:$0xff] }
 0x182   :  { %v649_v38 = vpop.f32.mrb[4].mxu0  ;;  %v790_v39 = vpop.f32.mrb[4].mxu1 }
 0x183   :  { %v801_v40 = vmax.f32 %v649_v38, %v790_v39  ;;  %v651_v33 = vpop.f32.mrb[5].mxu0  ;;  %v792_v42 = vpop.f32.mrb[5].mxu1  ;;  %v3613_v38 = vpack.c.bf16 %v1037_v61, %v1036_v26  ;;  %v3645_v39 = vpack.c.bf16 %v2590_v24, %v2589_v27  ;;  %v2616_v26 = vld [vmem:[%s6107_s3 + $0x3e8] sm:$0xff]  ;;  %v3661_v27 = vpack.c.bf16 %v2598_v52, %v2597_v14  ;;  %v1046_v24 = vld [vmem:[%s6107_s3 + $0x260] sm:$0xff] }
 0x184   :  { %v802_v19 = vmax.f32 %v651_v33, %v792_v42  ;;  %v1039_v33 = vld [vmem:[%s6107_s3 + $0x228] sm:$0xff]  ;;  %v3615_v42 = vpack.c.bf16 %v1055_v9, %v1054_v30  ;;  %v2599_v9 = vld [vmem:[%s6107_s3 + $0x360] sm:$0xff] }
 0x185   :  { %v1047_v30 = vld [vmem:[%s6107_s3 + $0x268] sm:$0xff]  ;;  %v2623_v14 = vld [vmem:[%s6107_s3 + $0x420] sm:$0xff] }
 0x186   :  { %v845_v43 = vmax.f32 %v801_v40, %v802_v19  ;;  %v655_v57 = vpop.f32.mrb[6].mxu0  ;;  %v796_v1 = vpop.f32.mrb[6].mxu1  ;;  %v1038_v40 = vld [vmem:[%s6107_s3 + $0x220] sm:$0xff]  ;;  %v3647_v19 = vpack.c.bf16 %v2608_v53, %v2607_v59  ;;  %v2600_v59 = vld [vmem:[%s6107_s3 + $0x368] sm:$0xff]  ;;  %v1064_v53 = vld [vmem:[%s6107_s3 + $0x2f0] sm:$0xff] }
 0x187   :  { %v803_v6 = vmax.f32 %v655_v57, %v796_v1  ;;  %v657_v20 = vpop.f32.mrb[7].mxu0  ;;  %v798_v29 = vpop.f32.mrb[7].mxu1  ;;  %v2592_v57 = vld [vmem:[%s6107_s3 + $0x328] sm:$0xff]  ;;  %v1056_v1 = vld [vmem:[%s6107_s3 + $0x2b0] sm:$0xff] }
 0x188   :  { %v847_v35 = vadd.f32 %v2586_v11, %v845_v43  ;;  %v804_v48 = vmax.f32 %v657_v20, %v798_v29  ;;  %v2591_v43 = vld [vmem:[%s6107_s3 + $0x320] sm:$0xff]  ;;  %v2609_v20 = vld [vmem:[%s6107_s3 + $0x3b0] sm:$0xff]  ;;  %v2610_v29 = vld [vmem:[%s6107_s3 + $0x3b8] sm:$0xff] }
 0x189   :  { %v2624_v52 = vld [vmem:[%s6107_s3 + $0x428] sm:$0xff] }
 0x18a   :  { %v849_v51 = vmax.f32 %v847_v35, 0.0  ;;  %v846_v37 = vmax.f32 %v803_v6, %v804_v48  ;;  %v1057_v6 = vld [vmem:[%s6107_s3 + $0x2b8] sm:$0xff]  ;;  %v3617_v35 = vpack.c.bf16 %v1039_v33, %v1038_v40  ;;  %v3649_v48 = vpack.c.bf16 %v2592_v57, %v2591_v43 }
 0x18b   :  { %v2618_v40 = vld [vmem:[%s6107_s3 + $0x3f8] sm:$0xff]  ;;  %v3633_v33 = vpack.c.bf16 %v1047_v30, %v1046_v24  ;;  %v3681_v30 = vpack.c.bf16 %v2624_v52, %v2623_v14 }
 0x18c   :  { %v853_v16 = vcombine.high %v849_v51, %v849_v51  ;;  %v860_v23 = vrot.slane %v849_v51, %v4257_v32  ;;  %v848_v4 = vadd.f32 %v2586_v11, %v846_v37  ;;  %v2587_v11 = vld [vmem:[%s6107_s3 + $0x300] sm:$0xff]  ;;  %v1040_v51 = vld [vmem:[%s6107_s3 + $0x230] sm:$0xff]  ;;  %v1041_v37 = vld [vmem:[%s6107_s3 + $0x238] sm:$0xff] }
 0x18d   :  { %v3641_v22 = vpack.c.bf16 %v2588_v41, %v2587_v11  ;;  %v1061_v11 = vld [vmem:[%s6107_s3 + $0x2d8] sm:$0xff]  ;;  %v2613_v41 = vld [vmem:[%s6107_s3 + $0x3d0] sm:$0xff] }
 0x18e   :  { %v867_v60 = vrot.slane %v853_v16, %v4257_v32  ;;  %v868_v63 = vcombine.high %v860_v23, %v860_v23  ;;  %v850_v54 = vmax.f32 %v848_v4, 0.0  ;;  %v3619_v16 = vpack.c.bf16 %v1057_v6, %v1056_v1  ;;  %v2593_v4 = vld [vmem:[%s6107_s3 + $0x330] sm:$0xff]  ;;  %v1049_v43 = vld [vmem:[%s6107_s3 + $0x278] sm:$0xff] }
 0x18f   :  { %v2601_v6 = vld [vmem:[%s6107_s3 + $0x370] sm:$0xff]  ;;  %v2674_v24 = vld [vmem:[%s6107_s3 + $0x5b8] sm:$0xff] }
 0x190   :  { %v896_v12 = vcombine.low %v860_v23, %v868_v63  ;;  %v932_v56 = vcombine.low %v868_v63, %v867_v60  ;;  %v876_v0 = vrot.slane %v850_v54, %v4257_v32  ;;  %v869_v3 = vcombine.high %v867_v60, %v867_v60  ;;  %v1058_v63 = vld [vmem:[%s6107_s3 + $0x2c0] sm:$0xff]  ;;  %v1059_v54 = vld [vmem:[%s6107_s3 + $0x2c8] sm:$0xff] }
 0x191   :  { %v3651_v23 = vpack.c.bf16 %v2610_v29, %v2609_v20  ;;  %v2602_v20 = vld [vmem:[%s6107_s3 + $0x378] sm:$0xff]  ;;  %v2635_v29 = vld [vmem:[%s6107_s3 + $0x480] sm:$0xff] }
 0x192   :  { %v877_v55 = vcombine.high %v876_v0, %v876_v0  ;;  %v897_v28 = vcombine.low %v867_v60, %v869_v3  ;;  %v933_v10 = vcombine.low %v869_v3, %v876_v0  ;;  %v904_v5 = vrot.slane %v896_v12, %v4257_v32  ;;  %v2594_v60 = vld [vmem:[%s6107_s3 + $0x338] sm:$0xff]  ;;  %v2611_v12 = vld [vmem:[%s6107_s3 + $0x3c0] sm:$0xff] }
 0x193   :  { %v940_v7 = vrot.slane %v932_v56, %v4257_v32  ;;  %v2612_v56 = vld [vmem:[%s6107_s3 + $0x3c8] sm:$0xff]  ;;  %v3653_v3 = vpack.c.bf16 %v2594_v60, %v2593_v4  ;;  %v2619_v60 = vld [vmem:[%s6107_s3 + $0x400] sm:$0xff] }
 0x194   :  { %v911_v45 = vrot.slane %v897_v28, %v4257_v32  ;;  %v947_v50 = vrot.slane %v933_v10, %v4257_v32  ;;  %v960_v15 = vcombine.low %v876_v0, %v877_v55  ;;  %v3621_v0 = vpack.c.bf16 %v1041_v37, %v1040_v51  ;;  %v1043_v55 = vld [vmem:[%s6107_s3 + $0x248] sm:$0xff] }
 0x195   :  { %v3623_v28 = vpack.c.bf16 %v1059_v54, %v1058_v63  ;;  %v3655_v10 = vpack.c.bf16 %v2612_v56, %v2611_v12  ;;  %v2668_v51 = vld [vmem:[%s6107_s3 + $0x588] sm:$0xff]  ;;  %v2651_v54 = vld [vmem:[%s6107_s3 + $0x500] sm:$0xff]  ;;  %v2637_v56 = vld [vmem:[%s6107_s3 + $0x490] sm:$0xff] }
 0x196   :  { %v4960_v21 = vcombine.low %v904_v5, %v911_v45  ;;  %v4962_v18 = vcombine.low %v940_v7, %v947_v50  ;;  %v967_v34 = vrot.slane %v960_v15, %v4257_v32  ;;  %v1060_v5 = vld [vmem:[%s6107_s3 + $0x2d0] sm:$0xff]  ;;  %v3625_v7 = vpack.c.bf16 %v1043_v55, %v1042_v47  ;;  %v2620_v63 = vld [vmem:[%s6107_s3 + $0x408] sm:$0xff]  ;;  %v2670_v47 = vld [vmem:[%s6107_s3 + $0x598] sm:$0xff] }
 0x197   :  { %v3657_v50 = vpack.c.bf16 %v2596_v2, %v2595_v46  ;;  %v1044_v15 = vld [vmem:[%s6107_s3 + $0x250] sm:$0xff]  ;;  %v3627_v17 = vpack.c.bf16 %v1061_v11, %v1060_v5  ;;  %v2652_v12 = vld [vmem:[%s6107_s3 + $0x508] sm:$0xff]  ;;  %v3673_v55 = vpack.c.bf16 %v2620_v63, %v2619_v60  ;;  %v2622_v46 = vld [vmem:[%s6107_s3 + $0x418] sm:$0xff] }
 0x198   :  { %1130 = vmatprep.mubr.f32.mxu0 %v4960_v21  ;;  %1200 = vmatprep.mubr.f32.mxu1 %v4962_v18  ;;  %v4984_v36 = vcombine.low %v911_v45, %v967_v34  ;;  %v2614_v45 = vld [vmem:[%s6107_s3 + $0x3d8] sm:$0xff]  ;;  %v2615_v34 = vld [vmem:[%s6107_s3 + $0x3e0] sm:$0xff]  ;;  %v3629_v61 = vpack.c.bf16 %v1045_v58, %v1044_v15  ;;  %v2653_v2 = vld [vmem:[%s6107_s3 + $0x510] sm:$0xff] }
 0x199   :  { %1131 = vmatmul.mubr.f32.vlgmr.msra.gmra.mrb[8].mxu0 %v4971_v62  ;;  %1201 = vmatmul.mubr.f32.vlgmr.msra.gmra.mrb[8].mxu1 %v4923_v8  ;;  %v2672_v15 = vld [vmem:[%s6107_s3 + $0x5a8] sm:$0xff] }
 0x19a   :  { %3610 = vmatpush3.bf16.msra.mxu0 %v3609_v13  ;;  %3642 = vmatpush3.bf16.msra.mxu1 %v3641_v22  ;;  %v3659_v13 = vpack.c.bf16 %v2614_v45, %v2613_v41  ;;  %v1063_v22 = vld [vmem:[%s6107_s3 + $0x2e8] sm:$0xff]  ;;  %v2654_v41 = vld [vmem:[%s6107_s3 + $0x518] sm:$0xff]  ;;  %v2639_v45 = vld [vmem:[%s6107_s3 + $0x4a0] sm:$0xff] }
 0x19b   :  { %1270 = vmatprep.mubr.f32.mxu0 %v4984_v36  ;;  %1437 = vmatprep.mubr.f32.mxu1 %v4960_v21 }
 0x19c   :  { %3612 = vmatprep.subr.bf16.mxu0 %v3611_v49  ;;  %3644 = vmatprep.subr.bf16.mxu1 %v3643_v44  ;;  %v3631_v49 = vpack.c.bf16 %v1063_v22, %v1062_v31  ;;  %v3663_v44 = vpack.c.bf16 %v2616_v26, %v2615_v34  ;;  %v2655_v31 = vld [vmem:[%s6107_s3 + $0x520] sm:$0xff]  ;;  %v2656_v34 = vld [vmem:[%s6107_s3 + $0x528] sm:$0xff]  ;;  %v2641_v26 = vld [vmem:[%s6107_s3 + $0x4b0] sm:$0xff] }
 0x19e   :  { %3614 = vmatpush3.bf16.msra.mxu0 %v3613_v38  ;;  %3646 = vmatpush3.bf16.msra.mxu1 %v3645_v39  ;;  %v1065_v38 = vld [vmem:[%s6107_s3 + $0x2f8] sm:$0xff]  ;;  %v2617_v39 = vld [vmem:[%s6107_s3 + $0x3f0] sm:$0xff] }
 0x19f   :  { %3616 = vmatprep.subr.bf16.mxu0 %v3615_v42  ;;  %3648 = vmatprep.subr.bf16.mxu1 %v3647_v19  ;;  %v3665_v42 = vpack.c.bf16 %v2600_v59, %v2599_v9  ;;  %v1048_v19 = vld [vmem:[%s6107_s3 + $0x270] sm:$0xff]  ;;  %v3635_v57 = vpack.c.bf16 %v1065_v38, %v1064_v53  ;;  %v3667_v1 = vpack.c.bf16 %v2618_v40, %v2617_v39  ;;  %v2626_v59 = vld [vmem:[%s6107_s3 + $0x438] sm:$0xff]  ;;  %v2643_v40 = vld [vmem:[%s6107_s3 + $0x4c0] sm:$0xff] }
 0x1a0   :  { %v3637_v37 = vpack.c.bf16 %v1049_v43, %v1048_v19  ;;  %v2625_v9 = vld [vmem:[%s6107_s3 + $0x430] sm:$0xff]  ;;  %v2658_v39 = vld [vmem:[%s6107_s3 + $0x538] sm:$0xff]  ;;  %v2676_v19 = vld [vmem:[%s6107_s3 + $0x5c8] sm:$0xff] }
 0x1a1   :  { %v2657_v53 = vld [vmem:[%s6107_s3 + $0x530] sm:$0xff]  ;;  %v3685_v43 = vpack.c.bf16 %v2626_v59, %v2625_v9 }
 0x1a2   :  { %3618 = vmatpush3.bf16.msra.mxu0 %v3617_v35  ;;  %3650 = vmatpush3.bf16.msra.mxu1 %v3649_v48  ;;  %v2636_v35 = vld [vmem:[%s6107_s3 + $0x488] sm:$0xff]  ;;  %v2667_v48 = vld [vmem:[%s6107_s3 + $0x580] sm:$0xff] }
 0x1a3   :  { %3620 = vmatprep.subr.bf16.mxu0 %v3619_v16  ;;  %3652 = vmatprep.subr.bf16.mxu1 %v3651_v23  ;;  %v3669_v16 = vpack.c.bf16 %v2602_v20, %v2601_v6  ;;  %v3671_v23 = vpack.c.bf16 %v2636_v35, %v2635_v29  ;;  %v3703_v4 = vpack.c.bf16 %v2668_v51, %v2667_v48  ;;  %v2627_v6 = vld [vmem:[%s6107_s3 + $0x440] sm:$0xff]  ;;  %v2628_v20 = vld [vmem:[%s6107_s3 + $0x448] sm:$0xff]  ;;  %v2645_v51 = vld [vmem:[%s6107_s3 + $0x4d0] sm:$0xff] }
 0x1a4   :  { %v2659_v29 = vld [vmem:[%s6107_s3 + $0x540] sm:$0xff]  ;;  %v2660_v48 = vld [vmem:[%s6107_s3 + $0x548] sm:$0xff] }
 0x1a5   :  { %v3721_v60 = vpack.c.bf16 %v2660_v48, %v2659_v29  ;;  %v2685_v29 = vld [vmem:[%s6107_s3 + $0x610] sm:$0xff] }
 0x1a6   :  { %3622 = vmatpush3.bf16.msra.mxu0 %v3621_v0  ;;  %3654 = vmatpush3.bf16.msra.mxu1 %v3653_v3  ;;  %v2638_v0 = vld [vmem:[%s6107_s3 + $0x498] sm:$0xff]  ;;  %v2669_v3 = vld [vmem:[%s6107_s3 + $0x590] sm:$0xff] }
 0x1a7   :  { %3624 = vmatprep.subr.bf16.mxu0 %v3623_v28  ;;  %3656 = vmatprep.subr.bf16.mxu1 %v3655_v10  ;;  %v3705_v28 = vpack.c.bf16 %v2652_v12, %v2651_v54  ;;  %v2621_v10 = vld [vmem:[%s6107_s3 + $0x410] sm:$0xff]  ;;  %v3675_v5 = vpack.c.bf16 %v2638_v0, %v2637_v56  ;;  %v3707_v11 = vpack.c.bf16 %v2670_v47, %v2669_v3  ;;  %v2630_v12 = vld [vmem:[%s6107_s3 + $0x458] sm:$0xff]  ;;  %v2647_v47 = vld [vmem:[%s6107_s3 + $0x4e0] sm:$0xff] }
 0x1a8   :  { %v3677_v58 = vpack.c.bf16 %v2622_v46, %v2621_v10  ;;  %v2629_v54 = vld [vmem:[%s6107_s3 + $0x450] sm:$0xff]  ;;  %v2662_v3 = vld [vmem:[%s6107_s3 + $0x558] sm:$0xff]  ;;  %v2680_v10 = vld [vmem:[%s6107_s3 + $0x5e8] sm:$0xff] }
 0x1a9   :  { %v2661_v56 = vld [vmem:[%s6107_s3 + $0x550] sm:$0xff]  ;;  %v3693_v46 = vpack.c.bf16 %v2630_v12, %v2629_v54 }
 0x1aa   :  { %3626 = vmatpush3.bf16.msra.mxu0 %v3625_v7  ;;  %3658 = vmatpush3.bf16.msra.mxu1 %v3657_v50  ;;  %v2640_v7 = vld [vmem:[%s6107_s3 + $0x4a8] sm:$0xff]  ;;  %v2671_v50 = vld [vmem:[%s6107_s3 + $0x5a0] sm:$0xff]  ;;  %v2717_v48 = vld [vmem:[%s6107_s3 + $0x710] sm:$0xff] }
 0x1ab   :  { %3628 = vmatprep.subr.bf16.mxu0 %v3627_v17  ;;  %3660 = vmatprep.subr.bf16.mxu1 %v3659_v13  ;;  %v3709_v17 = vpack.c.bf16 %v2654_v41, %v2653_v2  ;;  %v3679_v13 = vpack.c.bf16 %v2640_v7, %v2639_v45  ;;  %v3711_v22 = vpack.c.bf16 %v2672_v15, %v2671_v50  ;;  %v2632_v41 = vld [vmem:[%s6107_s3 + $0x468] sm:$0xff]  ;;  %v2663_v45 = vld [vmem:[%s6107_s3 + $0x560] sm:$0xff]  ;;  %v2649_v15 = vld [vmem:[%s6107_s3 + $0x4f0] sm:$0xff] }
 0x1ac   :  { %v3725_v2 = vpack.c.bf16 %v2662_v3, %v2661_v56  ;;  %v2664_v50 = vld [vmem:[%s6107_s3 + $0x568] sm:$0xff] }
 0x1ad   :  { %v3729_v52 = vpack.c.bf16 %v2664_v50, %v2663_v45  ;;  %v2688_v3 = vld [vmem:[%s6107_s3 + $0x628] sm:$0xff]  ;;  %v2690_v50 = vld [vmem:[%s6107_s3 + $0x638] sm:$0xff] }
 0x1ae   :  { %3630 = vmatpush3.bf16.msra.mxu0 %v3629_v61  ;;  %3662 = vmatpush3.bf16.msra.mxu1 %v3661_v27  ;;  %v2642_v61 = vld [vmem:[%s6107_s3 + $0x4b8] sm:$0xff]  ;;  %v2673_v27 = vld [vmem:[%s6107_s3 + $0x5b0] sm:$0xff] }
 0x1af   :  { %3632 = vmatprep.subr.bf16.mxu0 %v3631_v49  ;;  %3664 = vmatprep.subr.bf16.mxu1 %v3663_v44  ;;  %v3713_v49 = vpack.c.bf16 %v2656_v34, %v2655_v31  ;;  %v3683_v44 = vpack.c.bf16 %v2642_v61, %v2641_v26  ;;  %v3715_v38 = vpack.c.bf16 %v2674_v24, %v2673_v27  ;;  %v2634_v34 = vld [vmem:[%s6107_s3 + $0x478] sm:$0xff]  ;;  %v2665_v26 = vld [vmem:[%s6107_s3 + $0x570] sm:$0xff]  ;;  %v2699_v24 = vld [vmem:[%s6107_s3 + $0x680] sm:$0xff] }
 0x1b0   :  { %v2666_v27 = vld [vmem:[%s6107_s3 + $0x578] sm:$0xff] }
 0x1b1   :  { %v3733_v59 = vpack.c.bf16 %v2666_v27, %v2665_v26  ;;  %v2692_v27 = vld [vmem:[%s6107_s3 + $0x648] sm:$0xff] }
 0x1b2   :  { %3634 = vmatpush3.bf16.msra.mxu0 %v3633_v33  ;;  %3666 = vmatpush3.bf16.msra.mxu1 %v3665_v42  ;;  %v2644_v33 = vld [vmem:[%s6107_s3 + $0x4c8] sm:$0xff]  ;;  %v2675_v42 = vld [vmem:[%s6107_s3 + $0x5c0] sm:$0xff] }
 0x1b3   :  { %3636 = vmatprep.subr.bf16.mxu0 %v3635_v57  ;;  %3668 = vmatprep.subr.bf16.mxu1 %v3667_v1  ;;  %v3717_v57 = vpack.c.bf16 %v2658_v39, %v2657_v53  ;;  %v3687_v1 = vpack.c.bf16 %v2644_v33, %v2643_v40  ;;  %v3719_v35 = vpack.c.bf16 %v2676_v19, %v2675_v42  ;;  %v2684_v39 = vld [vmem:[%s6107_s3 + $0x608] sm:$0xff]  ;;  %v2715_v33 = vld [vmem:[%s6107_s3 + $0x700] sm:$0xff]  ;;  %v2701_v19 = vld [vmem:[%s6107_s3 + $0x690] sm:$0xff] }
 0x1b4   :  { %v2716_v42 = vld [vmem:[%s6107_s3 + $0x708] sm:$0xff] }
 0x1b6   :  { %3638 = vmatpush3.bf16.msra.mxu0 %v3637_v37  ;;  %3670 = vmatpush3.bf16.msra.mxu1 %v3669_v16  ;;  %v2646_v37 = vld [vmem:[%s6107_s3 + $0x4d8] sm:$0xff]  ;;  %v2677_v16 = vld [vmem:[%s6107_s3 + $0x5d0] sm:$0xff] }
 0x1b7   :  { %3672 = vmatprep.subr.bf16.mxu0 %v3671_v23  ;;  %3704 = vmatprep.subr.bf16.mxu1 %v3703_v4  ;;  %v2678_v23 = vld [vmem:[%s6107_s3 + $0x5d8] sm:$0xff]  ;;  %v3689_v4 = vpack.c.bf16 %v2628_v20, %v2627_v6  ;;  %v3691_v63 = vpack.c.bf16 %v2646_v37, %v2645_v51  ;;  %v3769_v20 = vpack.c.bf16 %v2716_v42, %v2715_v33  ;;  %v2693_v33 = vld [vmem:[%s6107_s3 + $0x650] sm:$0xff] }
 0x1b8   :  { %v3723_v0 = vpack.c.bf16 %v2678_v23, %v2677_v16  ;;  %v2734_v6 = vld [vmem:[%s6107_s3 + $0x798] sm:$0xff]  ;;  %v2703_v16 = vld [vmem:[%s6107_s3 + $0x6a0] sm:$0xff]  ;;  %v2704_v23 = vld [vmem:[%s6107_s3 + $0x6a8] sm:$0xff] }
 0x1b9   :  { %1271 = vmatmul.mubr.f32.vlgmr.msra.gmra.mrb[10].mxu0 %v4926_v25  ;;  %1438 = vmatmul.mubr.f32.vlgmr.msra.gmra.mrb[10].mxu1 %v4971_v62  ;;  %v2718_v37 = vld [vmem:[%s6107_s3 + $0x718] sm:$0xff]  ;;  %v3743_v56 = vpack.c.bf16 %v2704_v23, %v2703_v16  ;;  %v2696_v16 = vld [vmem:[%s6107_s3 + $0x668] sm:$0xff]  ;;  %v2727_v23 = vld [vmem:[%s6107_s3 + $0x760] sm:$0xff] }
 0x1ba   :  { %3674 = vmatpush3.bf16.msra.mxu0 %v3673_v55  ;;  %1507 = vmatprep.mubr.f32.mxu0 %v4962_v18  ;;  %v2648_v55 = vld [vmem:[%s6107_s3 + $0x4e8] sm:$0xff]  ;;  %v3773_v12 = vpack.c.bf16 %v2718_v37, %v2717_v48  ;;  %v2694_v42 = vld [vmem:[%s6107_s3 + $0x658] sm:$0xff]  ;;  %v2695_v37 = vld [vmem:[%s6107_s3 + $0x660] sm:$0xff] }
 0x1bb   :  { %3706 = vmatpush3.bf16.msra.mxu1 %v3705_v28  ;;  %1577 = vmatprep.mubr.f32.mxu1 %v4984_v36  ;;  %v2679_v28 = vld [vmem:[%s6107_s3 + $0x5e0] sm:$0xff] }
 0x1bc   :  { %3676 = vmatprep.subr.bf16.mxu0 %v3675_v5  ;;  %3708 = vmatprep.subr.bf16.mxu1 %v3707_v11  ;;  %v3695_v5 = vpack.c.bf16 %v2648_v55, %v2647_v47  ;;  %v2631_v11 = vld [vmem:[%s6107_s3 + $0x460] sm:$0xff]  ;;  %v3727_v7 = vpack.c.bf16 %v2680_v10, %v2679_v28  ;;  %v2720_v28 = vld [vmem:[%s6107_s3 + $0x728] sm:$0xff]  ;;  %v2705_v10 = vld [vmem:[%s6107_s3 + $0x6b0] sm:$0xff] }
 0x1bd   :  { %v3697_v14 = vpack.c.bf16 %v2632_v41, %v2631_v11  ;;  %v2719_v47 = vld [vmem:[%s6107_s3 + $0x720] sm:$0xff] }
 0x1be   :  { %3678 = vmatpush3.bf16.msra.mxu0 %v3677_v58  ;;  %v2650_v58 = vld [vmem:[%s6107_s3 + $0x4f8] sm:$0xff]  ;;  %v3777_v41 = vpack.c.bf16 %v2720_v28, %v2719_v47 }
 0x1bf   :  { %3710 = vmatpush3.bf16.msra.mxu1 %v3709_v17  ;;  %3680 = vmatprep.subr.bf16.mxu0 %v3679_v13  ;;  %v2681_v17 = vld [vmem:[%s6107_s3 + $0x5f0] sm:$0xff]  ;;  %v2682_v13 = vld [vmem:[%s6107_s3 + $0x5f8] sm:$0xff]  ;;  %v3699_v31 = vpack.c.bf16 %v2650_v58, %v2649_v15 }
 0x1c0   :  { %3712 = vmatprep.subr.bf16.mxu1 %v3711_v22  ;;  %v2633_v22 = vld [vmem:[%s6107_s3 + $0x470] sm:$0xff]  ;;  %v3731_v61 = vpack.c.bf16 %v2682_v13, %v2681_v17  ;;  %v2722_v17 = vld [vmem:[%s6107_s3 + $0x738] sm:$0xff]  ;;  %v2707_v13 = vld [vmem:[%s6107_s3 + $0x6c0] sm:$0xff] }
 0x1c1   :  { %v3701_v9 = vpack.c.bf16 %v2634_v34, %v2633_v22  ;;  %v2721_v15 = vld [vmem:[%s6107_s3 + $0x730] sm:$0xff]  ;;  %v2698_v28 = vld [vmem:[%s6107_s3 + $0x678] sm:$0xff] }
 0x1c2   :  { %3682 = vmatpush3.bf16.msra.mxu0 %v3681_v30  ;;  %v2700_v30 = vld [vmem:[%s6107_s3 + $0x688] sm:$0xff]  ;;  %v3781_v34 = vpack.c.bf16 %v2722_v17, %v2721_v15 }
 0x1c3   :  { %3714 = vmatpush3.bf16.msra.mxu1 %v3713_v49  ;;  %3684 = vmatprep.subr.bf16.mxu0 %v3683_v44  ;;  %v2731_v49 = vld [vmem:[%s6107_s3 + $0x780] sm:$0xff]  ;;  %v2732_v44 = vld [vmem:[%s6107_s3 + $0x788] sm:$0xff]  ;;  %v3735_v53 = vpack.c.bf16 %v2700_v30, %v2699_v24 }
 0x1c4   :  { %3716 = vmatprep.subr.bf16.mxu1 %v3715_v38  ;;  %v2683_v38 = vld [vmem:[%s6107_s3 + $0x600] sm:$0xff]  ;;  %v3767_v40 = vpack.c.bf16 %v2732_v44, %v2731_v49  ;;  %v2724_v49 = vld [vmem:[%s6107_s3 + $0x748] sm:$0xff]  ;;  %v2709_v44 = vld [vmem:[%s6107_s3 + $0x6d0] sm:$0xff] }
 0x1c5   :  { %v2723_v24 = vld [vmem:[%s6107_s3 + $0x740] sm:$0xff]  ;;  %v2748_v17 = vld [vmem:[%s6107_s3 + $0x808] sm:$0xff] }
 0x1c6   :  { %3686 = vmatpush3.bf16.msra.mxu0 %v3685_v43  ;;  %v2702_v43 = vld [vmem:[%s6107_s3 + $0x698] sm:$0xff] }
 0x1c7   :  { %3718 = vmatpush3.bf16.msra.mxu1 %v3717_v57  ;;  %3688 = vmatprep.subr.bf16.mxu0 %v3687_v1  ;;  %v3737_v57 = vpack.c.bf16 %v2684_v39, %v2683_v38  ;;  %v2733_v1 = vld [vmem:[%s6107_s3 + $0x790] sm:$0xff]  ;;  %v3739_v51 = vpack.c.bf16 %v2702_v43, %v2701_v19  ;;  %v3785_v39 = vpack.c.bf16 %v2724_v49, %v2723_v24 }
 0x1c8   :  { %3720 = vmatprep.subr.bf16.mxu1 %v3719_v35  ;;  %v2686_v35 = vld [vmem:[%s6107_s3 + $0x618] sm:$0xff]  ;;  %v2725_v19 = vld [vmem:[%s6107_s3 + $0x750] sm:$0xff] }
 0x1c9   :  { %v3741_v54 = vpack.c.bf16 %v2686_v35, %v2685_v29  ;;  %v2744_v29 = vld [vmem:[%s6107_s3 + $0x7e8] sm:$0xff]  ;;  %v3757_v35 = vpack.c.bf16 %v2694_v42, %v2693_v33  ;;  %v2749_v24 = vld [vmem:[%s6107_s3 + $0x810] sm:$0xff] }
 0x1ca   :  { %3690 = vmatpush3.bf16.msra.mxu0 %v3689_v4  ;;  %v3771_v4 = vpack.c.bf16 %v2734_v6, %v2733_v1  ;;  %v2711_v1 = vld [vmem:[%s6107_s3 + $0x6e0] sm:$0xff]  ;;  %v2712_v6 = vld [vmem:[%s6107_s3 + $0x6e8] sm:$0xff]  ;;  %v2781_v49 = vld [vmem:[%s6107_s3 + $0x910] sm:$0xff] }
 0x1cb   :  { %3722 = vmatpush3.bf16.msra.mxu1 %v3721_v60  ;;  %3692 = vmatprep.subr.bf16.mxu0 %v3691_v63  ;;  %v2735_v60 = vld [vmem:[%s6107_s3 + $0x7a0] sm:$0xff]  ;;  %v2736_v63 = vld [vmem:[%s6107_s3 + $0x7a8] sm:$0xff] }
 0x1cc   :  { %3724 = vmatprep.subr.bf16.mxu1 %v3723_v0  ;;  %v2687_v0 = vld [vmem:[%s6107_s3 + $0x620] sm:$0xff]  ;;  %v3775_v55 = vpack.c.bf16 %v2736_v63, %v2735_v60  ;;  %v2728_v60 = vld [vmem:[%s6107_s3 + $0x768] sm:$0xff]  ;;  %v2713_v63 = vld [vmem:[%s6107_s3 + $0x6f0] sm:$0xff] }
 0x1cd   :  { %v3745_v11 = vpack.c.bf16 %v2688_v3, %v2687_v0  ;;  %v3761_v0 = vpack.c.bf16 %v2696_v16, %v2695_v37  ;;  %v3793_v3 = vpack.c.bf16 %v2728_v60, %v2727_v23  ;;  %v2753_v23 = vld [vmem:[%s6107_s3 + $0x830] sm:$0xff] }
 0x1ce   :  { %3694 = vmatpush3.bf16.msra.mxu0 %v3693_v46  ;;  %v2706_v46 = vld [vmem:[%s6107_s3 + $0x6b8] sm:$0xff]  ;;  %v2785_v60 = vld [vmem:[%s6107_s3 + $0x930] sm:$0xff] }
 0x1cf   :  { %3726 = vmatpush3.bf16.msra.mxu1 %v3725_v2  ;;  %3696 = vmatprep.subr.bf16.mxu0 %v3695_v5  ;;  %v2737_v2 = vld [vmem:[%s6107_s3 + $0x7b0] sm:$0xff]  ;;  %v2738_v5 = vld [vmem:[%s6107_s3 + $0x7b8] sm:$0xff]  ;;  %v3747_v45 = vpack.c.bf16 %v2706_v46, %v2705_v10 }
 0x1d0   :  { %3728 = vmatprep.subr.bf16.mxu1 %v3727_v7  ;;  %v2689_v7 = vld [vmem:[%s6107_s3 + $0x630] sm:$0xff]  ;;  %v3779_v58 = vpack.c.bf16 %v2738_v5, %v2737_v2  ;;  %v2730_v2 = vld [vmem:[%s6107_s3 + $0x778] sm:$0xff]  ;;  %v2763_v5 = vld [vmem:[%s6107_s3 + $0x880] sm:$0xff] }
 0x1d1   :  { %v3749_v22 = vpack.c.bf16 %v2690_v50, %v2689_v7  ;;  %v2729_v10 = vld [vmem:[%s6107_s3 + $0x770] sm:$0xff] }
 0x1d2   :  { %3698 = vmatpush3.bf16.msra.mxu0 %v3697_v14  ;;  %v2708_v14 = vld [vmem:[%s6107_s3 + $0x6c8] sm:$0xff]  ;;  %v3797_v50 = vpack.c.bf16 %v2730_v2, %v2729_v10  ;;  %v2755_v10 = vld [vmem:[%s6107_s3 + $0x840] sm:$0xff] }
 0x1d3   :  { %3730 = vmatpush3.bf16.msra.mxu1 %v3729_v52  ;;  %3700 = vmatprep.subr.bf16.mxu0 %v3699_v31  ;;  %v2739_v52 = vld [vmem:[%s6107_s3 + $0x7c0] sm:$0xff]  ;;  %v2740_v31 = vld [vmem:[%s6107_s3 + $0x7c8] sm:$0xff]  ;;  %v3751_v26 = vpack.c.bf16 %v2708_v14, %v2707_v13 }
 0x1d4   :  { %3732 = vmatprep.subr.bf16.mxu1 %v3731_v61  ;;  %v2691_v61 = vld [vmem:[%s6107_s3 + $0x640] sm:$0xff]  ;;  %v3783_v30 = vpack.c.bf16 %v2740_v31, %v2739_v52  ;;  %v2780_v52 = vld [vmem:[%s6107_s3 + $0x908] sm:$0xff]  ;;  %v2765_v31 = vld [vmem:[%s6107_s3 + $0x890] sm:$0xff] }
 0x1d5   :  { %v3753_v38 = vpack.c.bf16 %v2692_v27, %v2691_v61  ;;  %v2779_v14 = vld [vmem:[%s6107_s3 + $0x900] sm:$0xff]  ;;  %v2798_v61 = vld [vmem:[%s6107_s3 + $0x998] sm:$0xff] }
 0x1d6   :  { %3702 = vmatpush3.bf16.msra.mxu0 %v3701_v9  ;;  %v2710_v9 = vld [vmem:[%s6107_s3 + $0x6d8] sm:$0xff]  ;;  %v3833_v27 = vpack.c.bf16 %v2780_v52, %v2779_v14  ;;  %v2787_v2 = vld [vmem:[%s6107_s3 + $0x940] sm:$0xff]  ;;  %v2789_v52 = vld [vmem:[%s6107_s3 + $0x950] sm:$0xff] }
 0x1d7   :  { %3734 = vmatpush3.bf16.msra.mxu1 %v3733_v59  ;;  %3736 = vmatprep.subr.bf16.mxu0 %v3735_v53  ;;  %v2741_v59 = vld [vmem:[%s6107_s3 + $0x7d0] sm:$0xff]  ;;  %v2742_v53 = vld [vmem:[%s6107_s3 + $0x7d8] sm:$0xff] }
 0x1d8   :  { %3768 = vmatprep.subr.bf16.mxu1 %v3767_v40  ;;  %v3755_v40 = vpack.c.bf16 %v2710_v9, %v2709_v44  ;;  %v3787_v43 = vpack.c.bf16 %v2742_v53, %v2741_v59  ;;  %v2782_v9 = vld [vmem:[%s6107_s3 + $0x918] sm:$0xff]  ;;  %v2767_v59 = vld [vmem:[%s6107_s3 + $0x8a0] sm:$0xff]  ;;  %v2768_v53 = vld [vmem:[%s6107_s3 + $0x8a8] sm:$0xff] }
 0x1d9   :  { %1508 = vmatmul.mubr.f32.vlgmr.msra.gmra.mrb[12].mxu0 %v4923_v8  ;;  %v3837_v42 = vpack.c.bf16 %v2782_v9, %v2781_v49  ;;  %v2758_v14 = vld [vmem:[%s6107_s3 + $0x858] sm:$0xff]  ;;  %v2760_v9 = vld [vmem:[%s6107_s3 + $0x868] sm:$0xff] }
 0x1da   :  { %1578 = vmatmul.mubr.f32.vlgmr.msra.gmra.mrb[12].mxu1 %v4926_v25  ;;  %3738 = vmatpush3.bf16.msra.mxu0 %v3737_v57  ;;  %v2726_v57 = vld [vmem:[%s6107_s3 + $0x758] sm:$0xff] }
 0x1db   :  { %1745 = vmatprep.mubr.f32.mxu0 %v4960_v21  ;;  %3770 = vmatpush3.bf16.msra.mxu1 %v3769_v20  ;;  %v2743_v20 = vld [vmem:[%s6107_s3 + $0x7e0] sm:$0xff]  ;;  %v3789_v48 = vpack.c.bf16 %v2726_v57, %v2725_v19  ;;  %v3807_v19 = vpack.c.bf16 %v2768_v53, %v2767_v59  ;;  %v2752_v57 = vld [vmem:[%s6107_s3 + $0x828] sm:$0xff] }
 0x1dc   :  { %1815 = vmatprep.mubr.f32.mxu1 %v4962_v18  ;;  %3740 = vmatprep.subr.bf16.mxu0 %v3739_v51  ;;  %v3759_v51 = vpack.c.bf16 %v2712_v6, %v2711_v1  ;;  %v2783_v1 = vld [vmem:[%s6107_s3 + $0x920] sm:$0xff] }
 0x1dd   :  { %3772 = vmatprep.subr.bf16.mxu1 %v3771_v4  ;;  %v3791_v4 = vpack.c.bf16 %v2744_v29, %v2743_v20  ;;  %v2784_v20 = vld [vmem:[%s6107_s3 + $0x928] sm:$0xff]  ;;  %v2769_v29 = vld [vmem:[%s6107_s3 + $0x8b0] sm:$0xff]  ;;  %v2791_v59 = vld [vmem:[%s6107_s3 + $0x960] sm:$0xff] }
 0x1de   :  { %3742 = vmatpush3.bf16.msra.mxu0 %v3741_v54  ;;  %v2714_v54 = vld [vmem:[%s6107_s3 + $0x6f8] sm:$0xff]  ;;  %v3841_v37 = vpack.c.bf16 %v2784_v20, %v2783_v1  ;;  %v2761_v1 = vld [vmem:[%s6107_s3 + $0x870] sm:$0xff] }
 0x1df   :  { %3774 = vmatpush3.bf16.msra.mxu1 %v3773_v12  ;;  %3744 = vmatprep.subr.bf16.mxu0 %v3743_v56  ;;  %v2745_v12 = vld [vmem:[%s6107_s3 + $0x7f0] sm:$0xff]  ;;  %v2746_v56 = vld [vmem:[%s6107_s3 + $0x7f8] sm:$0xff]  ;;  %v3763_v47 = vpack.c.bf16 %v2714_v54, %v2713_v63 }
 0x1e0   :  { %3776 = vmatprep.subr.bf16.mxu1 %v3775_v55  ;;  %v2697_v55 = vld [vmem:[%s6107_s3 + $0x670] sm:$0xff]  ;;  %v3795_v46 = vpack.c.bf16 %v2746_v56, %v2745_v12  ;;  %v2786_v54 = vld [vmem:[%s6107_s3 + $0x938] sm:$0xff]  ;;  %v2771_v12 = vld [vmem:[%s6107_s3 + $0x8c0] sm:$0xff] }
 0x1e1   :  { %v3765_v7 = vpack.c.bf16 %v2698_v28, %v2697_v55  ;;  %v2772_v56 = vld [vmem:[%s6107_s3 + $0x8c8] sm:$0xff]  ;;  %v3845_v55 = vpack.c.bf16 %v2786_v54, %v2785_v60  ;;  %v2793_v20 = vld [vmem:[%s6107_s3 + $0x970] sm:$0xff]  ;;  %v2811_v60 = vld [vmem:[%s6107_s3 + $0xa00] sm:$0xff] }
 0x1e2   :  { %3746 = vmatpush3.bf16.msra.mxu0 %v3745_v11  ;;  %v2764_v11 = vld [vmem:[%s6107_s3 + $0x888] sm:$0xff]  ;;  %v3815_v28 = vpack.c.bf16 %v2772_v56, %v2771_v12  ;;  %v2843_v12 = vld [vmem:[%s6107_s3 + $0xb00] sm:$0xff] }
 0x1e3   :  { %3778 = vmatpush3.bf16.msra.mxu1 %v3777_v41  ;;  %3748 = vmatprep.subr.bf16.mxu0 %v3747_v45  ;;  %v2795_v41 = vld [vmem:[%s6107_s3 + $0x980] sm:$0xff]  ;;  %v2796_v45 = vld [vmem:[%s6107_s3 + $0x988] sm:$0xff]  ;;  %v3799_v15 = vpack.c.bf16 %v2764_v11, %v2763_v5 }
 0x1e4   :  { %3780 = vmatprep.subr.bf16.mxu1 %v3779_v58  ;;  %v2747_v58 = vld [vmem:[%s6107_s3 + $0x800] sm:$0xff]  ;;  %v3831_v13 = vpack.c.bf16 %v2796_v45, %v2795_v41  ;;  %v2788_v11 = vld [vmem:[%s6107_s3 + $0x948] sm:$0xff]  ;;  %v2773_v41 = vld [vmem:[%s6107_s3 + $0x8d0] sm:$0xff] }
 0x1e5   :  { %v2774_v45 = vld [vmem:[%s6107_s3 + $0x8d8] sm:$0xff]  ;;  %v2844_v56 = vld [vmem:[%s6107_s3 + $0xb08] sm:$0xff] }
 0x1e6   :  { %3750 = vmatpush3.bf16.msra.mxu0 %v3749_v22  ;;  %v2766_v22 = vld [vmem:[%s6107_s3 + $0x898] sm:$0xff] }
 0x1e7   :  { %3782 = vmatpush3.bf16.msra.mxu1 %v3781_v34  ;;  %3752 = vmatprep.subr.bf16.mxu0 %v3751_v26  ;;  %v3801_v34 = vpack.c.bf16 %v2748_v17, %v2747_v58  ;;  %v2797_v26 = vld [vmem:[%s6107_s3 + $0x990] sm:$0xff]  ;;  %v3803_v44 = vpack.c.bf16 %v2766_v22, %v2765_v31  ;;  %v3849_v58 = vpack.c.bf16 %v2788_v11, %v2787_v2  ;;  %v2790_v22 = vld [vmem:[%s6107_s3 + $0x958] sm:$0xff] }
 0x1e8   :  { %3784 = vmatprep.subr.bf16.mxu1 %v3783_v30  ;;  %v2750_v30 = vld [vmem:[%s6107_s3 + $0x818] sm:$0xff]  ;;  %v3819_v17 = vpack.c.bf16 %v2774_v45, %v2773_v41  ;;  %v2831_v45 = vld [vmem:[%s6107_s3 + $0xaa0] sm:$0xff] }
 0x1e9   :  { %v3805_v33 = vpack.c.bf16 %v2750_v30, %v2749_v24  ;;  %v3853_v30 = vpack.c.bf16 %v2790_v22, %v2789_v52  ;;  %v2814_v2 = vld [vmem:[%s6107_s3 + $0xa18] sm:$0xff]  ;;  %v2815_v52 = vld [vmem:[%s6107_s3 + $0xa20] sm:$0xff] }
 0x1ea   :  { %3754 = vmatpush3.bf16.msra.mxu0 %v3753_v38  ;;  %v3835_v38 = vpack.c.bf16 %v2798_v61, %v2797_v26  ;;  %v2776_v26 = vld [vmem:[%s6107_s3 + $0x8e8] sm:$0xff]  ;;  %v2807_v61 = vld [vmem:[%s6107_s3 + $0x9e0] sm:$0xff]  ;;  %v2846_v41 = vld [vmem:[%s6107_s3 + $0xb18] sm:$0xff] }
 0x1eb   :  { %3786 = vmatpush3.bf16.msra.mxu1 %v3785_v39  ;;  %3756 = vmatprep.subr.bf16.mxu0 %v3755_v40  ;;  %v2799_v39 = vld [vmem:[%s6107_s3 + $0x9a0] sm:$0xff]  ;;  %v2800_v40 = vld [vmem:[%s6107_s3 + $0x9a8] sm:$0xff] }
 0x1ec   :  { %3788 = vmatprep.subr.bf16.mxu1 %v3787_v43  ;;  %v2751_v43 = vld [vmem:[%s6107_s3 + $0x820] sm:$0xff]  ;;  %v3839_v6 = vpack.c.bf16 %v2800_v40, %v2799_v39  ;;  %v2777_v39 = vld [vmem:[%s6107_s3 + $0x8f0] sm:$0xff]  ;;  %v2778_v40 = vld [vmem:[%s6107_s3 + $0x8f8] sm:$0xff] }
 0x1ed   :  { %v2847_v22 = vld [vmem:[%s6107_s3 + $0xb20] sm:$0xff] }
 0x1ee   :  { %3758 = vmatpush3.bf16.msra.mxu0 %v3757_v35  ;;  %v2770_v35 = vld [vmem:[%s6107_s3 + $0x8b8] sm:$0xff] }
 0x1ef   :  { %3790 = vmatpush3.bf16.msra.mxu1 %v3789_v48  ;;  %3760 = vmatprep.subr.bf16.mxu0 %v3759_v51  ;;  %v2801_v48 = vld [vmem:[%s6107_s3 + $0x9b0] sm:$0xff]  ;;  %v3809_v51 = vpack.c.bf16 %v2752_v57, %v2751_v43  ;;  %v3811_v16 = vpack.c.bf16 %v2770_v35, %v2769_v29  ;;  %v3827_v57 = vpack.c.bf16 %v2778_v40, %v2777_v39  ;;  %v2794_v35 = vld [vmem:[%s6107_s3 + $0x978] sm:$0xff]  ;;  %v2836_v39 = vld [vmem:[%s6107_s3 + $0xac8] sm:$0xff] }
 0x1f0   :  { %3792 = vmatprep.subr.bf16.mxu1 %v3791_v4  ;;  %v2754_v4 = vld [vmem:[%s6107_s3 + $0x838] sm:$0xff]  ;;  %v2867_v40 = vld [vmem:[%s6107_s3 + $0xbc0] sm:$0xff] }
 0x1f2   :  { %3762 = vmatpush3.bf16.msra.mxu0 %v3761_v0  ;;  %v2803_v0 = vld [vmem:[%s6107_s3 + $0x9c0] sm:$0xff] }
 0x1f3   :  { %3794 = vmatpush3.bf16.msra.mxu1 %v3793_v3  ;;  %3764 = vmatprep.subr.bf16.mxu0 %v3763_v47  ;;  %v2804_v3 = vld [vmem:[%s6107_s3 + $0x9c8] sm:$0xff]  ;;  %v3813_v47 = vpack.c.bf16 %v2754_v4, %v2753_v23  ;;  %v3861_v23 = vpack.c.bf16 %v2794_v35, %v2793_v20  ;;  %v2837_v35 = vld [vmem:[%s6107_s3 + $0xad0] sm:$0xff] }
 0x1f4   :  { %3796 = vmatprep.subr.bf16.mxu1 %v3795_v46  ;;  %v2756_v46 = vld [vmem:[%s6107_s3 + $0x848] sm:$0xff]  ;;  %v3847_v5 = vpack.c.bf16 %v2804_v3, %v2803_v0  ;;  %v2829_v0 = vld [vmem:[%s6107_s3 + $0xa90] sm:$0xff]  ;;  %v2830_v3 = vld [vmem:[%s6107_s3 + $0xa98] sm:$0xff] }
 0x1f5   :  { %v3867_v11 = vpack.c.bf16 %v2830_v3, %v2829_v0  ;;  %v2840_v0 = vld [vmem:[%s6107_s3 + $0xae8] sm:$0xff]  ;;  %v2871_v3 = vld [vmem:[%s6107_s3 + $0xbe0] sm:$0xff] }
 0x1f6   :  { %3766 = vmatpush3.bf16.msra.mxu0 %v3765_v7  ;;  %v2805_v7 = vld [vmem:[%s6107_s3 + $0x9d0] sm:$0xff] }
 0x1f7   :  { %3798 = vmatpush3.bf16.msra.mxu1 %v3797_v50  ;;  %3800 = vmatprep.subr.bf16.mxu0 %v3799_v15  ;;  %v2806_v50 = vld [vmem:[%s6107_s3 + $0x9d8] sm:$0xff]  ;;  %v3817_v15 = vpack.c.bf16 %v2756_v46, %v2755_v10  ;;  %v3897_v10 = vpack.c.bf16 %v2844_v56, %v2843_v12  ;;  %v2813_v46 = vld [vmem:[%s6107_s3 + $0xa10] sm:$0xff]  ;;  %v2839_v56 = vld [vmem:[%s6107_s3 + $0xae0] sm:$0xff] }
 0x1f8   :  { %3832 = vmatprep.subr.bf16.mxu1 %v3831_v13  ;;  %v2757_v13 = vld [vmem:[%s6107_s3 + $0x850] sm:$0xff]  ;;  %v3851_v31 = vpack.c.bf16 %v2806_v50, %v2805_v7  ;;  %v2832_v7 = vld [vmem:[%s6107_s3 + $0xaa8] sm:$0xff]  ;;  %v2854_v12 = vld [vmem:[%s6107_s3 + $0xb58] sm:$0xff] }
 0x1f9   :  { %1746 = vmatmul.mubr.f32.vlgmr.msra.gmra.mrb[14].mxu0 %v4971_v62  ;;  %v3821_v24 = vpack.c.bf16 %v2758_v14, %v2757_v13  ;;  %v3871_v14 = vpack.c.bf16 %v2832_v7, %v2831_v45  ;;  %v2841_v45 = vld [vmem:[%s6107_s3 + $0xaf0] sm:$0xff]  ;;  %v2842_v7 = vld [vmem:[%s6107_s3 + $0xaf8] sm:$0xff] }
 0x1fa   :  { %1816 = vmatmul.mubr.f32.vlgmr.msra.gmra.mrb[14].mxu1 %v4923_v8  ;;  %3802 = vmatpush3.bf16.msra.mxu0 %v3801_v34  ;;  %v2775_v34 = vld [vmem:[%s6107_s3 + $0x8e0] sm:$0xff] }
 0x1fb   :  { %1885 = vmatprep.mubr.f32.mxu0 %v4984_v36  ;;  %3834 = vmatpush3.bf16.msra.mxu1 %v3833_v27  ;;  %v2808_v27 = vld [vmem:[%s6107_s3 + $0x9e8] sm:$0xff]  ;;  %v3823_v49 = vpack.c.bf16 %v2776_v26, %v2775_v34  ;;  %v2833_v34 = vld [vmem:[%s6107_s3 + $0xab0] sm:$0xff]  ;;  %v2834_v26 = vld [vmem:[%s6107_s3 + $0xab8] sm:$0xff] }
 0x1fc   :  { %2053 = vmatprep.mubr.f32.mxu1 %v4960_v21  ;;  %3804 = vmatprep.subr.bf16.mxu0 %v3803_v44  ;;  %v2802_v21 = vld [vmem:[%s6107_s3 + $0x9b8] sm:$0xff]  ;;  %v2759_v44 = vld [vmem:[%s6107_s3 + $0x860] sm:$0xff]  ;;  %v3855_v53 = vpack.c.bf16 %v2808_v27, %v2807_v61  ;;  %v2865_v61 = vld [vmem:[%s6107_s3 + $0xbb0] sm:$0xff] }
 0x1fd   :  { %3836 = vmatprep.subr.bf16.mxu1 %v3835_v38  ;;  %v3843_v63 = vpack.c.bf16 %v2802_v21, %v2801_v48  ;;  %v2792_v38 = vld [vmem:[%s6107_s3 + $0x968] sm:$0xff]  ;;  %v2827_v48 = vld [vmem:[%s6107_s3 + $0xa80] sm:$0xff] }
 0x1fe   :  { %3806 = vmatpush3.bf16.msra.mxu0 %v3805_v33  ;;  %v2809_v33 = vld [vmem:[%s6107_s3 + $0x9f0] sm:$0xff]  ;;  %v3857_v43 = vpack.c.bf16 %v2792_v38, %v2791_v59  ;;  %v2828_v21 = vld [vmem:[%s6107_s3 + $0xa88] sm:$0xff]  ;;  %v2835_v38 = vld [vmem:[%s6107_s3 + $0xac0] sm:$0xff] }
 0x1ff   :  { %3838 = vmatpush3.bf16.msra.mxu1 %v3837_v42  ;;  %3808 = vmatprep.subr.bf16.mxu0 %v3807_v19  ;;  %v2810_v42 = vld [vmem:[%s6107_s3 + $0x9f8] sm:$0xff]  ;;  %v3825_v19 = vpack.c.bf16 %v2760_v9, %v2759_v44  ;;  %v3863_v4 = vpack.c.bf16 %v2828_v21, %v2827_v48  ;;  %v2849_v9 = vld [vmem:[%s6107_s3 + $0xb30] sm:$0xff] }
 0x200   :  { %3840 = vmatprep.subr.bf16.mxu1 %v3839_v6  ;;  %v2762_v6 = vld [vmem:[%s6107_s3 + $0x878] sm:$0xff]  ;;  %v3859_v29 = vpack.c.bf16 %v2810_v42, %v2809_v33  ;;  %v2868_v33 = vld [vmem:[%s6107_s3 + $0xbc8] sm:$0xff]  ;;  %v2869_v21 = vld [vmem:[%s6107_s3 + $0xbd0] sm:$0xff] }
 0x201   :  { %v2818_v44 = vld [vmem:[%s6107_s3 + $0xa38] sm:$0xff]  ;;  %v3911_v20 = vpack.c.bf16 %v2868_v33, %v2867_v40  ;;  %v2263_v33 = vld [vmem:[%s6109_s5] sm:$0xff] }
 0x202   :  { %3810 = vmatpush3.bf16.msra.mxu0 %v3809_v51  ;;  %v2859_v51 = vld [vmem:[%s6107_s3 + $0xb80] sm:$0xff]  ;;  %v2838_v48 = vld [vmem:[%s6107_s3 + $0xad8] sm:$0xff] }
 0x203   :  { %3842 = vmatpush3.bf16.msra.mxu1 %v3841_v37  ;;  %3812 = vmatprep.subr.bf16.mxu0 %v3811_v16  ;;  %v2860_v37 = vld [vmem:[%s6107_s3 + $0xb88] sm:$0xff]  ;;  %v3829_v16 = vpack.c.bf16 %v2762_v6, %v2761_v1  ;;  %v2851_v6 = vld [vmem:[%s6107_s3 + $0xb40] sm:$0xff] }
 0x204   :  { %3844 = vmatprep.subr.bf16.mxu1 %v3843_v63  ;;  %v2812_v63 = vld [vmem:[%s6107_s3 + $0xa08] sm:$0xff]  ;;  %v3895_v54 = vpack.c.bf16 %v2860_v37, %v2859_v51  ;;  %v2870_v51 = vld [vmem:[%s6107_s3 + $0xbd8] sm:$0xff] }
 0x205   :  { %v2820_v1 = vld [vmem:[%s6107_s3 + $0xa48] sm:$0xff] }
 0x206   :  { %3814 = vmatpush3.bf16.msra.mxu0 %v3813_v47  ;;  %v3865_v47 = vpack.c.bf16 %v2812_v63, %v2811_v60  ;;  %v2822_v60 = vld [vmem:[%s6107_s3 + $0xa58] sm:$0xff]  ;;  %v2853_v63 = vld [vmem:[%s6107_s3 + $0xb50] sm:$0xff] }
 0x207   :  { %3846 = vmatpush3.bf16.msra.mxu1 %v3845_v55  ;;  %3816 = vmatprep.subr.bf16.mxu0 %v3815_v28  ;;  %v2861_v55 = vld [vmem:[%s6107_s3 + $0xb90] sm:$0xff]  ;;  %v2862_v28 = vld [vmem:[%s6107_s3 + $0xb98] sm:$0xff] }
 0x208   :  { %3848 = vmatprep.subr.bf16.mxu1 %v3847_v5  ;;  %v2845_v5 = vld [vmem:[%s6107_s3 + $0xb10] sm:$0xff]  ;;  %v3899_v50 = vpack.c.bf16 %v2862_v28, %v2861_v55  ;;  %v3917_v28 = vpack.c.bf16 %v2854_v12, %v2853_v63 }
 0x209   :  { %v3901_v13 = vpack.c.bf16 %v2846_v41, %v2845_v5  ;;  %v2855_v5 = vld [vmem:[%s6107_s3 + $0xb60] sm:$0xff]  ;;  %v2856_v41 = vld [vmem:[%s6107_s3 + $0xb68] sm:$0xff]  ;;  %v2285_v63 = vld [vmem:[%s6109_s5 + $0xb0] sm:$0xff] }
 0x20a   :  { %3818 = vmatpush3.bf16.msra.mxu0 %v3817_v15  ;;  %v2863_v15 = vld [vmem:[%s6107_s3 + $0xba0] sm:$0xff] }
 0x20b   :  { %3850 = vmatpush3.bf16.msra.mxu1 %v3849_v58  ;;  %3820 = vmatprep.subr.bf16.mxu0 %v3819_v17  ;;  %v2864_v58 = vld [vmem:[%s6107_s3 + $0xba8] sm:$0xff]  ;;  %v3869_v17 = vpack.c.bf16 %v2814_v2, %v2813_v46  ;;  %v2823_v46 = vld [vmem:[%s6107_s3 + $0xa60] sm:$0xff] }
 0x20c   :  { %3852 = vmatprep.subr.bf16.mxu1 %v3851_v31  ;;  %v2816_v31 = vld [vmem:[%s6107_s3 + $0xa28] sm:$0xff] }
 0x20d   :  { %v3873_v27 = vpack.c.bf16 %v2816_v31, %v2815_v52  ;;  %v2824_v2 = vld [vmem:[%s6107_s3 + $0xa68] sm:$0xff]  ;;  %v2826_v52 = vld [vmem:[%s6107_s3 + $0xa78] sm:$0xff] }
 0x20e   :  { %3822 = vmatpush3.bf16.msra.mxu0 %v3821_v24 }
 0x20f   :  { %3854 = vmatpush3.bf16.msra.mxu1 %v3853_v30  ;;  %3824 = vmatprep.subr.bf16.mxu0 %v3823_v49  ;;  %v3875_v30 = vpack.c.bf16 %v2834_v26, %v2833_v34  ;;  %v2817_v49 = vld [vmem:[%s6107_s3 + $0xa30] sm:$0xff] }
 0x210   :  { %3856 = vmatprep.subr.bf16.mxu1 %v3855_v53  ;;  %v2850_v53 = vld [vmem:[%s6107_s3 + $0xb38] sm:$0xff]  ;;  %v3877_v42 = vpack.c.bf16 %v2818_v44, %v2817_v49 }
 0x212   :  { %3826 = vmatpush3.bf16.msra.mxu0 %v3825_v19  ;;  %v3909_v19 = vpack.c.bf16 %v2850_v53, %v2849_v9 }
 0x213   :  { %3858 = vmatpush3.bf16.msra.mxu1 %v3857_v43  ;;  %3828 = vmatprep.subr.bf16.mxu0 %v3827_v57  ;;  %v3879_v43 = vpack.c.bf16 %v2836_v39, %v2835_v38  ;;  %v2819_v57 = vld [vmem:[%s6107_s3 + $0xa40] sm:$0xff] }
 0x214   :  { %3860 = vmatprep.subr.bf16.mxu1 %v3859_v29  ;;  %v2852_v29 = vld [vmem:[%s6107_s3 + $0xb48] sm:$0xff]  ;;  %v3881_v37 = vpack.c.bf16 %v2820_v1, %v2819_v57  ;;  %v2282_v57 = vld [vmem:[%s6109_s5 + $0x98] sm:$0xff]  ;;  %v4113_v1 = vmov 0.0|0.0  }
 0x216   :  { %3830 = vmatpush3.bf16.msra.mxu0 %v3829_v16  ;;  %v3913_v16 = vpack.c.bf16 %v2852_v29, %v2851_v6  ;;  %v2265_v29 = vld [vmem:[%s6109_s5 + $0x10] sm:$0xff] }
 0x217   :  { %3862 = vmatpush3.bf16.msra.mxu1 %v3861_v23  ;;  %3864 = vmatprep.subr.bf16.mxu0 %v3863_v4  ;;  %v3883_v23 = vpack.c.bf16 %v2838_v48, %v2837_v35  ;;  %v2821_v4 = vld [vmem:[%s6107_s3 + $0xa50] sm:$0xff]  ;;  %v2266_v35 = vld [vmem:[%s6109_s5 + $0x18] sm:$0xff]  ;;  %v2283_v48 = vld [vmem:[%s6109_s5 + $0xa0] sm:$0xff] }
 0x218   :  { %3896 = vmatprep.subr.bf16.mxu1 %v3895_v54  ;;  %v3915_v54 = vpack.c.bf16 %v2870_v51, %v2869_v21  ;;  %v3885_v55 = vpack.c.bf16 %v2822_v60, %v2821_v4  ;;  %v2284_v21 = vld [vmem:[%s6109_s5 + $0xa8] sm:$0xff]  ;;  %v3933_v51 = vpack.c.bf16 %v2266_v35, %v2265_v29  ;;  %v2295_v4 = vld [vmem:[%s6109_s5 + $0x100] sm:$0xff] }
 0x219   :  { %1886 = vmatmul.mubr.f32.vlgmr.msra.gmra.mrb[16].mxu0 %v4926_v25  ;;  %v2296_v60 = vld [vmem:[%s6109_s5 + $0x108] sm:$0xff] }
 0x21a   :  { %2054 = vmatmul.mubr.f32.vlgmr.msra.gmra.mrb[16].mxu1 %v4971_v62  ;;  %3866 = vmatpush3.bf16.msra.mxu0 %v3865_v47  ;;  %v3903_v62 = vpack.c.bf16 %v2864_v58, %v2863_v15  ;;  %v2872_v47 = vld [vmem:[%s6107_s3 + $0xbe8] sm:$0xff]  ;;  %v2874_v15 = vld [vmem:[%s6107_s3 + $0xbf8] sm:$0xff]  ;;  %v3889_v58 = vpack.c.bf16 %v2824_v2, %v2823_v46  ;;  %v3960_v12 = vpack.c.bf16 %v2296_v60, %v2295_v4 }
 0x21b   :  { %2123 = vmatprep.mubr.f32.mxu0 %v4962_v18  ;;  %3898 = vmatpush3.bf16.msra.mxu1 %v3897_v10  ;;  %v2848_v18 = vld [vmem:[%s6107_s3 + $0xb28] sm:$0xff]  ;;  %v3887_v10 = vpack.c.bf16 %v2840_v0, %v2839_v56  ;;  %v2297_v56 = vld [vmem:[%s6109_s5 + $0x110] sm:$0xff]  ;;  %v2298_v0 = vld [vmem:[%s6109_s5 + $0x118] sm:$0xff] }
 0x21c   :  { %2193 = vmatprep.mubr.f32.mxu1 %v4984_v36  ;;  %3868 = vmatprep.subr.bf16.mxu0 %v3867_v11  ;;  %v2866_v36 = vld [vmem:[%s6107_s3 + $0xbb8] sm:$0xff]  ;;  %v3905_v24 = vpack.c.bf16 %v2848_v18, %v2847_v22  ;;  %v3919_v11 = vpack.c.bf16 %v2872_v47, %v2871_v3  ;;  %v2857_v22 = vld [vmem:[%s6107_s3 + $0xb70] sm:$0xff] }
 0x21d   :  { %3900 = vmatprep.subr.bf16.mxu1 %v3899_v50  ;;  %v3907_v59 = vpack.c.bf16 %v2866_v36, %v2865_v61  ;;  %v2873_v50 = vld [vmem:[%s6107_s3 + $0xbf0] sm:$0xff] }
 0x21e   :  { %3870 = vmatpush3.bf16.msra.mxu0 %v3869_v17  ;;  %v3921_v17 = vpack.c.bf16 %v2856_v41, %v2855_v5  ;;  %v3923_v31 = vpack.c.bf16 %v2874_v15, %v2873_v50  ;;  %v2270_v5 = vld [vmem:[%s6109_s5 + $0x38] sm:$0xff]  ;;  %v2300_v41 = vld [vmem:[%s6109_s5 + $0x128] sm:$0xff]  ;;  %v2287_v50 = vld [vmem:[%s6109_s5 + $0xc0] sm:$0xff] }
 0x21f   :  { %3902 = vmatpush3.bf16.msra.mxu1 %v3901_v13  ;;  %3872 = vmatprep.subr.bf16.mxu0 %v3871_v14  ;;  %v3891_v13 = vpack.c.bf16 %v2842_v7, %v2841_v45  ;;  %v2825_v14 = vld [vmem:[%s6107_s3 + $0xa70] sm:$0xff]  ;;  %v2288_v15 = vld [vmem:[%s6109_s5 + $0xc8] sm:$0xff] }
 0x220   :  { %3904 = vmatprep.subr.bf16.mxu1 %v3903_v62  ;;  %v2858_v62 = vld [vmem:[%s6107_s3 + $0xb78] sm:$0xff]  ;;  %v3893_v18 = vpack.c.bf16 %v2826_v52, %v2825_v14  ;;  %v3943_v52 = vpack.c.bf16 %v2288_v15, %v2287_v50 }
 0x221   :  { %v3925_v34 = vpack.c.bf16 %v2858_v62, %v2857_v22  ;;  %v2272_v22 = vld [vmem:[%s6109_s5 + $0x48] sm:$0xff] }
 0x222   :  { %3874 = vmatpush3.bf16.msra.mxu0 %v3873_v27 }
 0x223   :  { %3906 = vmatpush3.bf16.msra.mxu1 %v3905_v24  ;;  %3876 = vmatprep.subr.bf16.mxu0 %v3875_v30 }
 0x224   :  { %3908 = vmatprep.subr.bf16.mxu1 %v3907_v59 }
 0x226   :  { %3878 = vmatpush3.bf16.msra.mxu0 %v3877_v42 }
 0x227   :  { %3910 = vmatpush3.bf16.msra.mxu1 %v3909_v19  ;;  %3880 = vmatprep.subr.bf16.mxu0 %v3879_v43  ;;  %v2264_v19 = vld [vmem:[%s6109_s5 + $0x8] sm:$0xff]  ;;  %v2281_v43 = vld [vmem:[%s6109_s5 + $0x90] sm:$0xff] }
 0x228   :  { %3912 = vmatprep.subr.bf16.mxu1 %v3911_v20  ;;  %v3929_v6 = vpack.c.bf16 %v2264_v19, %v2263_v33  ;;  %v3931_v20 = vpack.c.bf16 %v2282_v57, %v2281_v43 }
 0x22a   :  { %3882 = vmatpush3.bf16.msra.mxu0 %v3881_v37  ;;  %v2267_v37 = vld [vmem:[%s6109_s5 + $0x20] sm:$0xff] }
 0x22b   :  { %3914 = vmatpush3.bf16.msra.mxu1 %v3913_v16  ;;  %3884 = vmatprep.subr.bf16.mxu0 %v3883_v23  ;;  %v3935_v16 = vpack.c.bf16 %v2284_v21, %v2283_v48  ;;  %v2268_v23 = vld [vmem:[%s6109_s5 + $0x28] sm:$0xff] }
 0x22c   :  { %3916 = vmatprep.subr.bf16.mxu1 %v3915_v54  ;;  %v2286_v54 = vld [vmem:[%s6109_s5 + $0xb8] sm:$0xff]  ;;  %v3937_v47 = vpack.c.bf16 %v2268_v23, %v2267_v37 }
 0x22d   :  { %v3939_v2 = vpack.c.bf16 %v2286_v54, %v2285_v63 }
 0x22e   :  { %3886 = vmatpush3.bf16.msra.mxu0 %v3885_v55  ;;  %v2269_v55 = vld [vmem:[%s6109_s5 + $0x30] sm:$0xff] }
 0x22f   :  { %3918 = vmatpush3.bf16.msra.mxu1 %v3917_v28  ;;  %3888 = vmatprep.subr.bf16.mxu0 %v3887_v10  ;;  %v3963_v28 = vpack.c.bf16 %v2298_v0, %v2297_v56  ;;  %v2301_v56 = vld [vmem:[%s6109_s5 + $0x130] sm:$0xff]  ;;  %v2302_v0 = vld [vmem:[%s6109_s5 + $0x138] sm:$0xff] }
 0x230   :  { %3920 = vmatprep.subr.bf16.mxu1 %v3919_v11  ;;  %v2299_v11 = vld [vmem:[%s6109_s5 + $0x120] sm:$0xff] }
 0x231   :  { %v3966_v14 = vpack.c.bf16 %v2300_v41, %v2299_v11 }
 0x232   :  { %3890 = vmatpush3.bf16.msra.mxu0 %v3889_v58 }
 0x233   :  { %3922 = vmatpush3.bf16.msra.mxu1 %v3921_v17  ;;  %3892 = vmatprep.subr.bf16.mxu0 %v3891_v13  ;;  %v3941_v13 = vpack.c.bf16 %v2270_v5, %v2269_v55  ;;  %v3969_v55 = vpack.c.bf16 %v2302_v0, %v2301_v56 }
 0x234   :  { %3924 = vmatprep.subr.bf16.mxu1 %v3923_v31  ;;  %v2271_v31 = vld [vmem:[%s6109_s5 + $0x40] sm:$0xff] }
 0x236   :  { %3894 = vmatpush3.bf16.msra.mxu0 %v3893_v18  ;;  %v2289_v18 = vld [vmem:[%s6109_s5 + $0xd0] sm:$0xff] }
 0x237   :  { %3926 = vmatpush3.bf16.msra.mxu1 %v3925_v34  ;;  %v2290_v34 = vld [vmem:[%s6109_s5 + $0xd8] sm:$0xff] }
 0x238   :  { %3959 = vmatprep.subr.bf16.mxu1 %v4113_v1 }
 0x239   :  { %2124 = vmatmul.mubr.f32.vlgmr.msra.gmra.mrb[18].mxu0 %v4923_v8  ;;  %v2279_v8 = vld [vmem:[%s6109_s5 + $0x80] sm:$0xff] }
 0x23a   :  { %2194 = vmatmul.mubr.f32.vlgmr.msra.gmra.mrb[18].mxu1 %v4926_v25  ;;  %v2280_v25 = vld [vmem:[%s6109_s5 + $0x88] sm:$0xff] }
 0x23b   :  { %v3927_v42 = vpack.c.bf16 %v2280_v25, %v2279_v8  ;;  %3961 = vmatpush3.bf16.msra.mxu1 %v3960_v12  ;;  %v2875_v12 = vld [vmem:[%s6108_s4] ss:$0 sm:$0xff] }
 0x23c   :  { %3962 = vmatprep.subr.bf16.mxu1 %v4113_v1 }
 0x23d   :  { %3928 = vmatprep.subr.bf16.mxu0 %v3927_v42 }
 0x23e   :  { %3930 = vmatpush3.bf16.msra.mxu0 %v3929_v6 }
 0x23f   :  { %3932 = vmatprep.subr.bf16.mxu0 %v3931_v20  ;;  %3964 = vmatpush3.bf16.msra.mxu1 %v3963_v28  ;;  %v2294_v28 = vld [vmem:[%s6109_s5 + $0xf8] sm:$0xff] }
 0x240   :  { %3965 = vmatprep.subr.bf16.mxu1 %v4113_v1 }
 0x242   :  { %3934 = vmatpush3.bf16.msra.mxu0 %v3933_v51 }
 0x243   :  { %3936 = vmatprep.subr.bf16.mxu0 %v3935_v16  ;;  %3967 = vmatpush3.bf16.msra.mxu1 %v3966_v14 }
 0x244   :  { %3968 = vmatprep.subr.bf16.mxu1 %v4113_v1 }
 0x246   :  { %3938 = vmatpush3.bf16.msra.mxu0 %v3937_v47 }
 0x247   :  { %3940 = vmatprep.subr.bf16.mxu0 %v3939_v2  ;;  %v4115_v2 = vmov 0.0   ;;  %3970 = vmatpush3.bf16.msra.mxu1 %v3969_v55 }
 0x248   :  { %3369 = vmatprep.mubr.msk.f32.mxu1 %vm4114_vm8, %v4115_v2  ;;  %3971 = vmatprep.subr.bf16.mxu1 %v4113_v1 }
 0x24a   :  { %3942 = vmatpush3.bf16.msra.mxu0 %v3941_v13 }
 0x24b   :  { %3944 = vmatprep.subr.bf16.mxu0 %v3943_v52 }
 0x26c   :  { %v2912_v26 = vpop.f32.mrb[8].mxu0  ;;  %v2947_v61 = vpop.f32.mrb[8].mxu1 }
 0x26d   :  { %v2913_v36 = vpop.f32.mrb[9].mxu0  ;;  %v2948_v27 = vpop.f32.mrb[9].mxu1 }
 0x26e   :  { %v2914_v24 = vadd.f32 %v2913_v36, %v2912_v26  ;;  %v2949_v30 = vadd.f32 %v2948_v27, %v2947_v61  ;;  %v3945_v61 = vpack.c.bf16 %v2272_v22, %v2271_v31  ;;  %v3947_v36 = vpack.c.bf16 %v2290_v34, %v2289_v18  ;;  %v2273_v27 = vld [vmem:[%s6109_s5 + $0x50] sm:$0xff]  ;;  %v2454_v31 = vld [vmem:[%s6111_s7] sm:$0xff]  ;;  %v2455_v22 = vld [vmem:[%s6111_s7 + $0x8] sm:$0xff] }
 0x26f   :  { %v3972_v34 = vpack.c.bf16 %v2455_v22, %v2454_v31 }
 0x270   :  { %v1203_v49 = vadd.f32 %v2949_v30, %v2914_v24  ;;  %v2274_v24 = vld [vmem:[%s6109_s5 + $0x58] sm:$0xff]  ;;  %v2291_v30 = vld [vmem:[%s6109_s5 + $0xe0] sm:$0xff]  ;;  %3946 = vmatpush3.bf16.msra.mxu0 %v3945_v61 }
 0x271   :  { %3948 = vmatprep.subr.bf16.mxu0 %v3947_v36 }
 0x28c   :  { %v2982_v44 = vpop.f32.mrb[10].mxu0  ;;  %v3017_v9 = vpop.f32.mrb[10].mxu1 }
 0x28d   :  { %v2983_v59 = vpop.f32.mrb[11].mxu0  ;;  %v3018_v53 = vpop.f32.mrb[11].mxu1 }
 0x28e   :  { %v2984_v38 = vadd.f32 %v2983_v59, %v2982_v44  ;;  %v3019_v39 = vadd.f32 %v3018_v53, %v3017_v9  ;;  %v3949_v44 = vpack.c.bf16 %v2274_v24, %v2273_v27  ;;  %v2275_v59 = vld [vmem:[%s6109_s5 + $0x60] sm:$0xff]  ;;  %v2276_v53 = vld [vmem:[%s6109_s5 + $0x68] sm:$0xff]  ;;  %v2456_v27 = vld [vmem:[%s6111_s7 + $0x10] sm:$0xff] }
 0x28f   :  { %v2457_v24 = vld [vmem:[%s6111_s7 + $0x18] sm:$0xff] }
 0x290   :  { %v5917_v40 = vadd.f32 %v2984_v38, %v1203_v49  ;;  %v2292_v49 = vld [vmem:[%s6109_s5 + $0xe8] sm:$0xff]  ;;  %3950 = vmatpush3.bf16.msra.mxu0 %v3949_v44  ;;  %v3953_v38 = vpack.c.bf16 %v2276_v53, %v2275_v59  ;;  %v2460_v59 = vld [vmem:[%s6111_s7 + $0x30] sm:$0xff]  ;;  %v2461_v53 = vld [vmem:[%s6111_s7 + $0x38] sm:$0xff] }
 0x291   :  { %v3951_v9 = vpack.c.bf16 %v2292_v49, %v2291_v30  ;;  %v3975_v30 = vpack.c.bf16 %v2457_v24, %v2456_v27  ;;  %v2458_v49 = vld [vmem:[%s6111_s7 + $0x20] sm:$0xff]  ;;  %v2459_v44 = vld [vmem:[%s6111_s7 + $0x28] sm:$0xff] }
 0x293   :  { %3952 = vmatprep.subr.bf16.mxu0 %v3951_v9  ;;  %v3978_v9 = vpack.c.bf16 %v2459_v44, %v2458_v49 }
 0x294   :  { %3954 = vmatpush3.bf16.msra.mxu0 %v3953_v38  ;;  %v3981_v38 = vpack.c.bf16 %v2461_v53, %v2460_v59 }
 0x2ac   :  { %v3052_v3 = vpop.f32.mrb[12].mxu0 }
 0x2ad   :  { %v3087_v10 = vpop.f32.mrb[12].mxu1  ;;  %v3053_v46 = vpop.f32.mrb[13].mxu0 }
 0x2ae   :  { %v3054_v45 = vadd.f32 %v3053_v46, %v3052_v3  ;;  %v3088_v7 = vpop.f32.mrb[13].mxu1  ;;  %v2293_v3 = vld [vmem:[%s6109_s5 + $0xf0] sm:$0xff]  ;;  %v2278_v46 = vld [vmem:[%s6109_s5 + $0x78] sm:$0xff] }
 0x2af   :  { %v3089_v58 = vadd.f32 %v3088_v7, %v3087_v10  ;;  %v2277_v10 = vld [vmem:[%s6109_s5 + $0x70] sm:$0xff]  ;;  %v3955_v5 = vpack.c.bf16 %v2294_v28, %v2293_v3  ;;  %s4116_s5 = smov 80  }
 0x2b0   :  { %v1510_v17 = vadd.f32 %v3054_v45, %v3019_v39  ;;  %v3957_v11 = vpack.c.bf16 %v2278_v46, %v2277_v10 }
 0x2b1   :  { %3956 = vmatprep.subr.bf16.mxu0 %v3955_v5 }
 0x2b2   :  { %v1580_v62 = vadd.f32 %v3089_v58, %v1510_v17  ;;  %3958 = vmatpush3.bf16.msra.mxu0 %v3957_v11 }
 0x2b4   :  { %v1583_v26 = vmax.f32 %v5917_v40, %v1580_v62 }
 0x2cc   :  { %v3122_v39 = vpop.f32.mrb[14].mxu0 }
 0x2cd   :  { %v3157_v40 = vpop.f32.mrb[14].mxu1  ;;  %v3123_v8 = vpop.f32.mrb[15].mxu0 }
 0x2ce   :  { %v3124_v25 = vadd.f32 %v3123_v8, %v3122_v39  ;;  %v3158_v33 = vpop.f32.mrb[15].mxu1 }
 0x2cf   :  { %v3159_v42 = vadd.f32 %v3158_v33, %v3157_v40 }
 0x2d1   :  { %v1818_v19 = vadd.f32 %v3159_v42, %v3124_v25  ;;  %v2876_v25 = vld [vmem:[%s6110_s6] ss:$0 sm:$0xff]  ;;  %s4118_s6 = smov [#allocation2]  }
 0x2d2   :  { %s2562_s7 = sshll.u32 %s4118_s6, 4  ;;  %s2563_s7 = int_to_ptr.vmem [resolvable:$true] %s2562_s7 }
 0x2d3   :  { %p4088_p1 = scmp.lt.s32.totalorder %s2563_s7, %s2563_s7 }
 0x2ec   :  { %v3192_v43 = vpop.f32.mrb[16].mxu0 }
 0x2ed   :  { %v3227_v57 = vpop.f32.mrb[16].mxu1  ;;  %v3193_v6 = vpop.f32.mrb[17].mxu0 }
 0x2ee   :  { %v3194_v20 = vadd.f32 %v3193_v6, %v3192_v43  ;;  %v3228_v29 = vpop.f32.mrb[17].mxu1 }
 0x2ef   :  { %v3229_v35 = vadd.f32 %v3228_v29, %v3227_v57  ;;  %v2878_v57 = vld [vmem:[%s6112_s8] ss:$0 sm:$0xff]  ;;  %s4083_s8 = scalar_lea.vmem %s2563_s7, 32 }
 0x2f0   :  { %v1888_v48 = vadd.f32 %v3194_v20, %v1818_v19  ;;  %p4084_p0 = scmp.ne.s32.totalorder %s2563_s7, %s4083_s8  ;;  %p4089_p2 = scmp.lt.s32.totalorder %s4083_s8, %s4083_s8 }
 0x2f2   :  { %v1891_v21 = vmax.f32 %v1583_v26, %v1888_v48  ;;  %p4090_p3 = por %p4089_p2, %p4088_p1 }
 0x2f4   :  { %p4091_p4 = pnand %p4090_p3, %p4084_p0 }
 0x30c   :  { %v3262_v51 = vpop.f32.mrb[18].mxu0 }
 0x30d   :  { %v3297_v37 = vpop.f32.mrb[18].mxu1  ;;  %v3263_v16 = vpop.f32.mrb[19].mxu0 }
 0x30e   :  { %v3264_v23 = vadd.f32 %v3263_v16, %v3262_v51  ;;  %v3298_v4 = vpop.f32.mrb[19].mxu1 }
 0x30f   :  { %v3299_v60 = vadd.f32 %v3298_v4, %v3297_v37 }
 0x310   :  { %v2126_v63 = vadd.f32 %v3264_v23, %v3229_v35 }
 0x312   :  { %v2196_v54 = vadd.f32 %v3299_v60, %v2126_v63 }
 0x314   :  { %v2199_v47 = vmax.f32 %v1891_v21, %v2196_v54 }
 0x316   :  { %v2207_v41 = vadd.f32 %v2875_v12, %v2199_v47 }
 0x318   :  { %v2208_v45 = vmax.f32 %v2207_v41, 0.0 }
 0x31a   :  { %v2217_v7 = vrot.slane %v2208_v45, %v4257_v32  ;;  %v2210_v50 = vcombine.high %v2208_v45, %v2208_v45 }
 0x31c   :  { %v2225_v15 = vcombine.high %v2217_v7, %v2217_v7  ;;  %v2224_v58 = vrot.slane %v2210_v50, %v4257_v32 }
 0x31e   :  { %v2234_v17 = vrot.slane %v2225_v15, %v4257_v32  ;;  %v2244_v13 = vrot.slane %v2224_v58, %v4257_v32  ;;  %v2226_v14 = vcombine.high %v2224_v58, %v2224_v58 }
 0x320   :  { %2235 = vrot.lane.b32.xlu0 %v2234_v17, %s4116_s5  ;;  %2245 = vrot.lane.b32.xlu1 %v2244_v13, %s4117_s13  ;;  %v2254_v52 = vrot.slane %v2226_v14, %v4257_v32 }
 0x324   :  { %2255 = vrot.lane.b32.xlu0 %v2254_v52, %s4110_s29 }
 0x392   :  { %v2236_v62 = vpop.permute.xlu0 %2235  ;;  %v2246_v18 = vpop.permute.xlu1 %2245 }
 0x393   :  { %v2261_v26 = vsel %vm2260_vm9, %v2236_v62, %v2246_v18  ;;  %v2259_v36 = vsel %vm2258_vm11, %v2217_v7, %v2236_v62 }
 0x396   :  { %v2256_v61 = vpop.permute.xlu0 %2255 }
 0x397   :  { %3370 = vmatmul.mubr.msk.f32.vlgmr.msra.gmra.mrb[20].mxu1 %vm2310_vm10, %v2256_v61  ;;  %v2262_v32 = vsel %vm282_vm7, %v2261_v26, %v2256_v61 }
 0x398   :  { %2377 = vmatprep.mubr.f32.mxu0 %v2262_v32  ;;  %3973 = vmatpush3.bf16.msra.mxu1 %v3972_v34 }
 0x399   :  { %2378 = vmatmul.mubr.f32.vlgmr.msra.gmra.mrb[20].mxu0 %v2259_v36  ;;  %3974 = vmatprep.subr.bf16.mxu1 %v4113_v1 }
 0x39a   :  { %3388 = vmatprep.mubr.msk.f32.mxu1 %vm4114_vm8, %v4115_v2 }
 0x39c   :  { %3976 = vmatpush3.bf16.msra.mxu1 %v3975_v30 }
 0x39d   :  { %3977 = vmatprep.subr.bf16.mxu1 %v4113_v1 }
 0x3a0   :  { %3979 = vmatpush3.bf16.msra.mxu1 %v3978_v9 }
 0x3a1   :  { %3980 = vmatprep.subr.bf16.mxu1 %v4113_v1 }
 0x3a4   :  { %3982 = vmatpush3.bf16.msra.mxu1 %v3981_v38 }
 0x46a   :  { %v2449_v39 = vpop.f32.mrb[20].mxu1 }
 0x46b   :  { %v3371_v40 = vpop.f32.mrb[21].mxu1 }
 0x46c   :  { %v3332_v8 = vpop.f32.mrb[20].mxu0 }
 0x46d   :  { %v3333_v33 = vpop.f32.mrb[21].mxu0 }
 0x46e   :  { %v3334_v42 = vadd.f32 %v3333_v33, %v3332_v8 }
 0x470   :  { %v2380_v1 = vadd.f32 %v3334_v42, %v2876_v25 }
 0x472   :  { %v2450_v19 = vadd.f32 %v2449_v39, %v2380_v1 }
 0x474   :  { %v2453_v43 = vmax.f32 %v2450_v19, 0.0 }
 0x476   :  { %3389 = vmatmul.mubr.msk.f32.vlgmr.msra.gmra.mrb[22].mxu1 %vm2310_vm10, %v2453_v43 }
 0x549   :  { %v2538_v6 = vpop.f32.mrb[22].mxu1 }
 0x54a   :  { %v2539_v20 = vadd.f32 %v2878_v57, %v2538_v6  ;;  %v3390_v29 = vpop.f32.mrb[23].mxu1 }
 0x54c   :  { %v2543_v35 = vsel %vm2542_vm12, %v2539_v20, -inf }
 0x54d   :  { %2544 = vmax.xlane.f32.xlu1 %v2543_v35 }
 0x5da   :  { %v2545_v48 = vpop.xlane.xlu1 %2544 }
 0x5db   :  { %v2546_v21 = vsub.f32 %v2539_v20, %v2545_v48 }
 0x5dd   :  { %v2547_v51 = vmul.f32 1.442695, %v2546_v21 }
 0x5df   :  { %4079 = vpow2.f32 %v2547_v51 }
 0x5e9   :  { %v4080_v37 = vpop.eup %4079 }
 0x5ea   :  { %v2549_v16 = vsel %vm2542_vm12, %v4080_v37, 0.0 }
 0x5eb   :  { %2550 = vadd.xlane.f32.xlu0 %v2549_v16 }
 0x678   :  { %v2551_v23 = vpop.xlane.xlu0 %2550 }
 0x679   :  { %4081 = vlog2.f32 %v2551_v23 }
 0x683   :  { %v4082_v4 = vpop.eup %4081 }
 0x684   :  { %v2553_v60 = vmul.f32 0.6931472, %v4082_v4 }
 0x686   :  { %v2554_v63 = vsub.f32 %v2546_v21, %v2553_v60 }
 0x688   :  { %2555 = vst [vmem:[#allocation2] sm:$0x3] %v2554_v63 }
 0x689   :  { %4094 = shalt.err (!%p4091_p4)
}
 0x68a   :  { %s4095_s4 = scalar_lea.hbm %s6113_s9, 32 }
 0x68b   :  { %p4096_p5 = scmp.ne.s32.totalorder %s6113_s9, %s4095_s4  ;;  %p4099_p6 = scmp.lt.u32.totalorder %s4095_s4, %s6113_s9 }
 0x68d   :  { %p4101_p7 = pnand %p4099_p6, %p4096_p5 }
 0x68f   :  { %4104 = shalt.err (!%p4101_p7)
}
 0x690   :  { %2565 = dma.vmem_to_hbm [thread:$0]  %s2563_s7, 32, %s6113_s9, [#allocation3]  }
 0x691   :  { %4105 = dma.done.wait [#allocation3], 32  }
 0x692   :  { %4106 = vsyncadd [#allocation3], 4294967264 }
 0x693   :  { %2569 = vsyncpa [#allocation3], 1 }

</bundles_post_ra>
